<compile_context>
chip_gen: v7x
topology: tpu7x:2x2x1
jax: 0.10.0
libtpu: 0.0.40
codegen_flags: <defaults>
</compile_context>

<pallas_src>
import jax
import jax.numpy as jnp
from jax import lax
from jax.experimental import pallas as pl
from jax.experimental.pallas import tpu as pltpu


def gru_kernel(gx_ref, h0_ref, whh_ref, bhn_ref, out_ref, h_scratch):
    """One grid step = one (batch shard, time block).

    gx_ref : (T_blk, B_blk, 3*Hp)  precomputed x@W_ih^T + b_ih (+ b_hr/b_hz folded)
    h0_ref : (1, B_blk, Hp)
    whh_ref: (Hp, 3*Hp)            fused W_hh^T (gh = h @ whh_ref), bf16 or f32
    bhn_ref: (1, Hp)               b_hn (must stay inside r*(.) per torch GRU)
    out_ref: (T_blk, B_blk, Hp)
    h_scratch: (B_blk, Hp) f32     hidden state carried across time blocks
    """
    t_blk = pl.program_id(1)

    @pl.when(t_blk == 0)
    def _():
        h_scratch[...] = h0_ref[0].astype(jnp.float32)

    n_steps, _, _ = gx_ref.shape
    hp = whh_ref.shape[0]
    mxu_dtype = whh_ref.dtype

    # Hoisted once per grid step (JAX does not CSE broadcasts inside the loop).
    bhn = bhn_ref[...].astype(jnp.float32)                    # (1, Hp)

    def step(i, h):
        gx = gx_ref[i].astype(jnp.float32)                    # (B_blk, 3*Hp)
        # ONE fused recurrent matmul per step: (B,Hp)x(Hp,3Hp), f32 accumulation.
        gh = jnp.dot(h.astype(mxu_dtype), whh_ref[...],
                     preferred_element_type=jnp.float32)      # (B_blk, 3*Hp)
        # torch GRU gate order r, z, n; lane slices at multiples of Hp (Hp%128==0).
        r = jax.nn.sigmoid(gx[:, :hp] + gh[:, :hp])
        z = jax.nn.sigmoid(gx[:, hp:2 * hp] + gh[:, hp:2 * hp])
        # b_hn sits INSIDE r*(.) in torch's GRU, so it cannot be folded into gx.
        n = jnp.tanh(gx[:, 2 * hp:] + r * (gh[:, 2 * hp:] + bhn))
        h_new = (1.0 - z) * n + z * h
        out_ref[i] = h_new.astype(out_ref.dtype)
        return h_new

    h_final = lax.fori_loop(0, n_steps, step, h_scratch[...],
                            unroll=min(8, n_steps))           # partial unroll
    h_scratch[...] = h_final


def _choose_blocks(S, B_pad, H_pad, gx_bytes, out_bytes, w_bytes):
    """Largest (t_block, b_block) whose double-buffered VMEM footprint fits a
    conservative budget (sized for v7x's 64 MiB physical VMEM)."""
    budget = 40 << 20

    def vmem_bytes(t, b):
        gx_blk = t * b * 3 * H_pad * gx_bytes
        out_blk = t * b * H_pad * out_bytes
        whh = H_pad * 3 * H_pad * w_bytes
        h0_blk = b * H_pad * out_bytes
        bhn = H_pad * 4
        scratch = b * H_pad * 4
        # BlockSpec double-buffers every operand (incl. constant-index weights).
        return 2 * (gx_blk + out_blk + whh + h0_blk + bhn) + scratch

    b_cands = [c for c in (256, 128, 64, 32, 16, 8) if c <= B_pad and B_pad % c == 0] or [B_pad]
    t_cands = [c for c in (128, 64, 32, 16, 8, 4, 2, 1) if c <= S and S % c == 0] or [S]
    for b in b_cands:
        for t in t_cands:
            if vmem_bytes(t, b) <= budget:
                return t, b, vmem_bytes(t, b)
    t, b = t_cands[-1], b_cands[-1]
    return t, b, vmem_bytes(t, b)


def gru_forward(x, h0, w_ih, w_hh, b_ih, b_hh, *, mxu_dtype=None):
    """x: (S, B, H), h0: (1, B, H), w_*: (3H, H) torch (r,z,n) order, b_*: (3H,).

    Returns (output (S, B, H), hidden (1, B, H)) matching torch.nn.GRU.
    mxu_dtype controls the recurrent-weight / gx storage / matmul-operand dtype
    (f32 accumulation, f32 hidden carry and f32 gate math regardless).
    """
    S, B, H = x.shape
    if mxu_dtype is None:
        mxu_dtype = x.dtype
    f32 = jnp.float32

    # Pad batch to the sublane width (8) and hidden to the lane width (128).
    # Padded lanes/rows stay exactly zero through the recurrence.
    B_pad = ((B + 7) // 8) * 8
    H_pad = ((H + 127) // 128) * 128
    if B_pad != B:
        x = jnp.pad(x, ((0, 0), (0, B_pad - B), (0, 0)))
        h0 = jnp.pad(h0, ((0, 0), (0, B_pad - B), (0, 0)))
    if H_pad != H:
        h0 = jnp.pad(h0, ((0, 0), (0, 0), (0, H_pad - H)))

    w_ih3 = w_ih.reshape(3, H, H).astype(f32)
    w_hh3 = w_hh.reshape(3, H, H).astype(f32)
    b_ih3 = b_ih.reshape(3, H).astype(f32)
    b_hh3 = b_hh.reshape(3, H).astype(f32)

    # Fused + lane-padded weights: gate g occupies lanes [g*H_pad, g*H_pad + H).
    w_ih_p = jnp.zeros((H, 3 * H_pad), f32)        # for x @ w_ih_p
    whh_p = jnp.zeros((H_pad, 3 * H_pad), f32)     # for h @ whh_p
    bias_p = jnp.zeros((3 * H_pad,), f32)
    for g in range(3):
        w_ih_p = w_ih_p.at[:, g * H_pad:g * H_pad + H].set(w_ih3[g].T)
        whh_p = whh_p.at[:H, g * H_pad:g * H_pad + H].set(w_hh3[g].T)
        bg = b_ih3[g] + (b_hh3[g] if g < 2 else 0.0)   # fold b_hr/b_hz, not b_hn
        bias_p = bias_p.at[g * H_pad:g * H_pad + H].set(bg)
    bhn_p = jnp.zeros((1, H_pad), f32).at[0, :H].set(b_hh3[2])

    # Hoisted input projection: one big parallel matmul over all S*B rows,
    # produced directly in the fused/padded lane layout (no transpose pass).
    gx = x.reshape(S * B_pad, H).astype(f32) @ w_ih_p + bias_p
    gx = gx.reshape(S, B_pad, 3 * H_pad).astype(mxu_dtype)

    whh_p = whh_p.astype(mxu_dtype)

    t_block, b_block, vmem_est = _choose_blocks(
        S, B_pad, H_pad,
        gx_bytes=jnp.dtype(mxu_dtype).itemsize,
        out_bytes=jnp.dtype(x.dtype).itemsize,
        w_bytes=jnp.dtype(mxu_dtype).itemsize)
    grid = (B_pad // b_block, S // t_block)

    out = pl.pallas_call(
        gru_kernel,
        out_shape=jax.ShapeDtypeStruct((S, B_pad, H_pad), x.dtype),
        grid_spec=pltpu.PrefetchScalarGridSpec(
            num_scalar_prefetch=0,
            grid=grid,
            in_specs=[
                pl.BlockSpec((t_block, b_block, 3 * H_pad), lambda b, t: (t, b, 0)),  # gx
                pl.BlockSpec((1, b_block, H_pad),           lambda b, t: (0, b, 0)),  # h0
                pl.BlockSpec((H_pad, 3 * H_pad),            lambda b, t: (0, 0)),     # W_hh fused
                pl.BlockSpec((1, H_pad),                    lambda b, t: (0, 0)),     # b_hn
            ],
            out_specs=pl.BlockSpec((t_block, b_block, H_pad), lambda b, t: (t, b, 0)),
            scratch_shapes=[pltpu.VMEM((b_block, H_pad), jnp.float32)],  # carried h
        ),
        compiler_params=pltpu.CompilerParams(
            # Batch shards are independent (megacore); time is strictly sequential.
            dimension_semantics=("parallel", "arbitrary"),
            vmem_limit_bytes=int(min(max(vmem_est + (8 << 20), 32 << 20), 56 << 20)),
        ),
    )(gx, h0, whh_p, bhn_p)

    if B_pad != B or H_pad != H:
        out = out[:, :B, :H]          # only copies when padding was applied
    hn = out[S - 1:S]                 # final hidden == last output step
    return out, hn


def gru_ref(x, h0, w_ih, w_hh, b_ih, b_hh):
    """Pure-JAX reference matching torch.nn.GRU semantics."""
    H = h0.shape[-1]

    def step(h, xt):
        gx = xt @ w_ih.T + b_ih
        gh = h @ w_hh.T + b_hh
        r = jax.nn.sigmoid(gx[:, :H] + gh[:, :H])
        z = jax.nn.sigmoid(gx[:, H:2 * H] + gh[:, H:2 * H])
        n = jnp.tanh(gx[:, 2 * H:] + r * gh[:, 2 * H:])
        h_new = (1.0 - z) * n + z * h
        return h_new, h_new

    h_last, ys = lax.scan(step, h0[0], x)
    return ys, h_last[None]


if __name__ == "__main__":
    S, B, H = 8, 4, 32      # seq_len, batch, hidden_size

    key = jax.random.PRNGKey(0)
    kx, k1, k2, k3, k4 = jax.random.split(key, 5)

    # PyTorch nn.GRU default init: U(-1/sqrt(H), 1/sqrt(H)) for all params.
    bound = 1.0 / jnp.sqrt(jnp.float32(H))
    w_ih = jax.random.uniform(k1, (3 * H, H), jnp.float32, -bound, bound)
    w_hh = jax.random.uniform(k2, (3 * H, H), jnp.float32, -bound, bound)
    b_ih = jax.random.uniform(k3, (3 * H,), jnp.float32, -bound, bound)
    b_hh = jax.random.uniform(k4, (3 * H,), jnp.float32, -bound, bound)

    x = jax.random.normal(kx, (S, B, H), jnp.float32)
    h0 = jnp.zeros((1, B, H), jnp.float32)   # EncoderLf.initHidden

    out_ref_, hn_ref_ = gru_ref(x, h0, w_ih, w_hh, b_ih, b_hh)

    # f32 MXU-operand path: tight check against the pure-JAX reference.
    out, hn = gru_forward(x, h0, w_ih, w_hh, b_ih, b_hh, mxu_dtype=jnp.float32)
    out = jax.block_until_ready(out)
    hn = jax.block_until_ready(hn)
    assert out.shape == (S, B, H) and hn.shape == (1, B, H)
    assert jnp.allclose(out, out_ref_, rtol=1e-5, atol=1e-5), "output mismatch"
    assert jnp.allclose(hn, hn_ref_, rtol=1e-5, atol=1e-5), "hidden mismatch"

    # bf16 MXU-operand path (the recommended fast path): looser check since
    # bf16 rounding compounds over the recurrence.
    out_bf, hn_bf = gru_forward(x, h0, w_ih, w_hh, b_ih, b_hh, mxu_dtype=jnp.bfloat16)
    out_bf = jax.block_until_ready(out_bf)
    hn_bf = jax.block_until_ready(hn_bf)
    assert jnp.allclose(out_bf, out_ref_, rtol=5e-2, atol=5e-2), "bf16 output mismatch"
    assert jnp.allclose(hn_bf, hn_ref_, rtol=5e-2, atol=5e-2), "bf16 hidden mismatch"

    print("KERNEL_OK")
</pallas_src>

<mosaic_0001>
module attributes {stable_mosaic.version = 11 : i64} {
  func.func @gru_kernel(%arg0: i32, %arg1: i32, %arg2: memref<8x8x384xf32, #tpu.memory_space<vmem>>, %arg3: memref<1x8x128xf32, #tpu.memory_space<vmem>>, %arg4: memref<128x384xf32, #tpu.memory_space<vmem>>, %arg5: memref<1x128xf32, #tpu.memory_space<vmem>>, %arg6: memref<8x8x128xf32, #tpu.memory_space<vmem>>, %arg7: memref<8x128xf32, #tpu.memory_space<vmem>>) attributes {dimension_semantics = [#tpu.dimension_semantics<parallel>, #tpu.dimension_semantics<arbitrary>], iteration_bounds = array<i64: 1, 1>, scalar_prefetch = 0 : i64, scratch_operands = 1 : i64, tpu.core_type = #tpu.core_type<tc>, window_params = [{transform_indices = @transform_0, window_bounds = array<i64: 8, 8, 384>}, {transform_indices = @transform_1, window_bounds = array<i64: 1, 8, 128>}, {pipeline_mode = #tpu.pipeline_mode<synchronous>, transform_indices = @transform_2, window_bounds = array<i64: 128, 384>}, {pipeline_mode = #tpu.pipeline_mode<synchronous>, transform_indices = @transform_3, window_bounds = array<i64: 1, 128>}, {transform_indices = @transform_4, window_bounds = array<i64: 8, 8, 128>}]} {
    %c0_i32 = arith.constant 0 : i32
    %0 = arith.cmpi eq, %arg1, %c0_i32 : i32
    %1 = arith.extui %0 : i1 to i32
    %c0_i32_0 = arith.constant 0 : i32
    %2 = arith.cmpi ne, %1, %c0_i32_0 : i32
    scf.if %2 {
      %c0_86 = arith.constant 0 : index
      %c0_87 = arith.constant 0 : index
      %c0_88 = arith.constant 0 : index
      %302 = vector.load %arg3[%c0_86, %c0_87, %c0_88] : memref<1x8x128xf32, #tpu.memory_space<vmem>>, vector<1x8x128xf32>
      %303 = vector.shape_cast %302 : vector<1x8x128xf32> to vector<8x128xf32>
      %c0_89 = arith.constant 0 : index
      %c0_90 = arith.constant 0 : index
      %304 = vector.load %arg7[%c0_89, %c0_90] : memref<8x128xf32, #tpu.memory_space<vmem>>, vector<8x128xf32>
      tpu.vector_store %arg7[%c0_89, %c0_90], %303 {strides = array<i32>} : memref<8x128xf32, #tpu.memory_space<vmem>>, vector<8x128xf32>,
    } else {
    }
    %c0 = arith.constant 0 : index
    %c0_1 = arith.constant 0 : index
    %3 = vector.load %arg5[%c0, %c0_1] : memref<1x128xf32, #tpu.memory_space<vmem>>, vector<1x128xf32>
    %c0_2 = arith.constant 0 : index
    %c0_3 = arith.constant 0 : index
    %4 = vector.load %arg7[%c0_2, %c0_3] : memref<8x128xf32, #tpu.memory_space<vmem>>, vector<8x128xf32>
    %c0_i32_4 = arith.constant 0 : i32
    %5 = arith.index_cast %c0_i32_4 : i32 to index
    %c0_5 = arith.constant 0 : index
    %c0_6 = arith.constant 0 : index
    %6 = vector.load %arg2[%5, %c0_5, %c0_6] : memref<8x8x384xf32, #tpu.memory_space<vmem>>, vector<1x8x384xf32>
    %7 = vector.shape_cast %6 : vector<1x8x384xf32> to vector<8x384xf32>
    %c0_7 = arith.constant 0 : index
    %c0_8 = arith.constant 0 : index
    %8 = vector.load %arg4[%c0_7, %c0_8] : memref<128x384xf32, #tpu.memory_space<vmem>>, vector<128x384xf32>
    %cst = arith.constant dense<0.000000e+00> : vector<8x384xf32>
    %9 = tpu.matmul %4, %8, %cst {dimension_numbers = #tpu.dot_dimension_numbers<[1], [0], [0], [1], [0, 0, 1, 1], [], []>} : vector<8x128xf32>, vector<128x384xf32>, vector<8x384xf32> -> vector<8x384xf32>
    %10 = vector.extract_strided_slice %7 {offsets = [0, 0], sizes = [8, 128], strides = [1, 1]} : vector<8x384xf32> to vector<8x128xf32>
    %11 = vector.extract_strided_slice %9 {offsets = [0, 0], sizes = [8, 128], strides = [1, 1]} : vector<8x384xf32> to vector<8x128xf32>
    %12 = arith.addf %10, %11 : vector<8x128xf32>
    %13 = arith.negf %12 : vector<8x128xf32>
    %14 = math.exp %13 : vector<8x128xf32>
    %cst_9 = arith.constant 1.000000e+00 : f32
    %15 = vector.broadcast %cst_9 : f32 to vector<8x128xf32>
    %16 = arith.addf %15, %14 : vector<8x128xf32>
    %17 = arith.divf %15, %16 : vector<8x128xf32>
    %18 = vector.extract_strided_slice %7 {offsets = [0, 128], sizes = [8, 128], strides = [1, 1]} : vector<8x384xf32> to vector<8x128xf32>
    %19 = vector.extract_strided_slice %9 {offsets = [0, 128], sizes = [8, 128], strides = [1, 1]} : vector<8x384xf32> to vector<8x128xf32>
    %20 = arith.addf %18, %19 : vector<8x128xf32>
    %21 = arith.negf %20 : vector<8x128xf32>
    %22 = math.exp %21 : vector<8x128xf32>
    %cst_10 = arith.constant 1.000000e+00 : f32
    %23 = vector.broadcast %cst_10 : f32 to vector<8x128xf32>
    %24 = arith.addf %23, %22 : vector<8x128xf32>
    %25 = arith.divf %23, %24 : vector<8x128xf32>
    %26 = vector.extract_strided_slice %7 {offsets = [0, 256], sizes = [8, 128], strides = [1, 1]} : vector<8x384xf32> to vector<8x128xf32>
    %27 = vector.extract_strided_slice %9 {offsets = [0, 256], sizes = [8, 128], strides = [1, 1]} : vector<8x384xf32> to vector<8x128xf32>
    %28 = vector.broadcast %3 : vector<1x128xf32> to vector<8x128xf32>
    %29 = arith.addf %27, %28 : vector<8x128xf32>
    %30 = arith.mulf %17, %29 : vector<8x128xf32>
    %31 = arith.addf %26, %30 : vector<8x128xf32>
    %32 = math.tanh %31 : vector<8x128xf32>
    %cst_11 = arith.constant 1.000000e+00 : f32
    %33 = vector.broadcast %cst_11 : f32 to vector<8x128xf32>
    %34 = arith.subf %33, %25 : vector<8x128xf32>
    %35 = arith.mulf %34, %32 : vector<8x128xf32>
    %36 = arith.mulf %25, %4 : vector<8x128xf32>
    %37 = arith.addf %35, %36 : vector<8x128xf32>
    %38 = arith.index_cast %c0_i32_4 : i32 to index
    %c0_12 = arith.constant 0 : index
    %c0_13 = arith.constant 0 : index
    %39 = vector.load %arg6[%38, %c0_12, %c0_13] : memref<8x8x128xf32, #tpu.memory_space<vmem>>, vector<1x8x128xf32>
    %40 = vector.shape_cast %39 : vector<1x8x128xf32> to vector<8x128xf32>
    %41 = vector.shape_cast %37 : vector<8x128xf32> to vector<1x8x128xf32>
    tpu.vector_store %arg6[%38, %c0_12, %c0_13], %41 {strides = array<i32>} : memref<8x8x128xf32, #tpu.memory_space<vmem>>, vector<1x8x128xf32>,
    %c1_i32 = arith.constant 1 : i32
    %42 = arith.index_cast %c1_i32 : i32 to index
    %c0_14 = arith.constant 0 : index
    %c0_15 = arith.constant 0 : index
    %43 = vector.load %arg2[%42, %c0_14, %c0_15] : memref<8x8x384xf32, #tpu.memory_space<vmem>>, vector<1x8x384xf32>
    %44 = vector.shape_cast %43 : vector<1x8x384xf32> to vector<8x384xf32>
    %c0_16 = arith.constant 0 : index
    %c0_17 = arith.constant 0 : index
    %45 = vector.load %arg4[%c0_16, %c0_17] : memref<128x384xf32, #tpu.memory_space<vmem>>, vector<128x384xf32>
    %cst_18 = arith.constant dense<0.000000e+00> : vector<8x384xf32>
    %46 = tpu.matmul %37, %45, %cst_18 {dimension_numbers = #tpu.dot_dimension_numbers<[1], [0], [0], [1], [0, 0, 1, 1], [], []>} : vector<8x128xf32>, vector<128x384xf32>, vector<8x384xf32> -> vector<8x384xf32>
    %47 = vector.extract_strided_slice %44 {offsets = [0, 0], sizes = [8, 128], strides = [1, 1]} : vector<8x384xf32> to vector<8x128xf32>
    %48 = vector.extract_strided_slice %46 {offsets = [0, 0], sizes = [8, 128], strides = [1, 1]} : vector<8x384xf32> to vector<8x128xf32>
    %49 = arith.addf %47, %48 : vector<8x128xf32>
    %50 = arith.negf %49 : vector<8x128xf32>
    %51 = math.exp %50 : vector<8x128xf32>
    %cst_19 = arith.constant 1.000000e+00 : f32
    %52 = vector.broadcast %cst_19 : f32 to vector<8x128xf32>
    %53 = arith.addf %52, %51 : vector<8x128xf32>
    %54 = arith.divf %52, %53 : vector<8x128xf32>
    %55 = vector.extract_strided_slice %44 {offsets = [0, 128], sizes = [8, 128], strides = [1, 1]} : vector<8x384xf32> to vector<8x128xf32>
    %56 = vector.extract_strided_slice %46 {offsets = [0, 128], sizes = [8, 128], strides = [1, 1]} : vector<8x384xf32> to vector<8x128xf32>
    %57 = arith.addf %55, %56 : vector<8x128xf32>
    %58 = arith.negf %57 : vector<8x128xf32>
    %59 = math.exp %58 : vector<8x128xf32>
    %cst_20 = arith.constant 1.000000e+00 : f32
    %60 = vector.broadcast %cst_20 : f32 to vector<8x128xf32>
    %61 = arith.addf %60, %59 : vector<8x128xf32>
    %62 = arith.divf %60, %61 : vector<8x128xf32>
    %63 = vector.extract_strided_slice %44 {offsets = [0, 256], sizes = [8, 128], strides = [1, 1]} : vector<8x384xf32> to vector<8x128xf32>
    %64 = vector.extract_strided_slice %46 {offsets = [0, 256], sizes = [8, 128], strides = [1, 1]} : vector<8x384xf32> to vector<8x128xf32>
    %65 = vector.broadcast %3 : vector<1x128xf32> to vector<8x128xf32>
    %66 = arith.addf %64, %65 : vector<8x128xf32>
    %67 = arith.mulf %54, %66 : vector<8x128xf32>
    %68 = arith.addf %63, %67 : vector<8x128xf32>
    %69 = math.tanh %68 : vector<8x128xf32>
    %cst_21 = arith.constant 1.000000e+00 : f32
    %70 = vector.broadcast %cst_21 : f32 to vector<8x128xf32>
    %71 = arith.subf %70, %62 : vector<8x128xf32>
    %72 = arith.mulf %71, %69 : vector<8x128xf32>
    %73 = arith.mulf %62, %37 : vector<8x128xf32>
    %74 = arith.addf %72, %73 : vector<8x128xf32>
    %75 = arith.index_cast %c1_i32 : i32 to index
    %c0_22 = arith.constant 0 : index
    %c0_23 = arith.constant 0 : index
    %76 = vector.load %arg6[%75, %c0_22, %c0_23] : memref<8x8x128xf32, #tpu.memory_space<vmem>>, vector<1x8x128xf32>
    %77 = vector.shape_cast %76 : vector<1x8x128xf32> to vector<8x128xf32>
    %78 = vector.shape_cast %74 : vector<8x128xf32> to vector<1x8x128xf32>
    tpu.vector_store %arg6[%75, %c0_22, %c0_23], %78 {strides = array<i32>} : memref<8x8x128xf32, #tpu.memory_space<vmem>>, vector<1x8x128xf32>,
    %c2_i32 = arith.constant 2 : i32
    %79 = arith.index_cast %c2_i32 : i32 to index
    %c0_24 = arith.constant 0 : index
    %c0_25 = arith.constant 0 : index
    %80 = vector.load %arg2[%79, %c0_24, %c0_25] : memref<8x8x384xf32, #tpu.memory_space<vmem>>, vector<1x8x384xf32>
    %81 = vector.shape_cast %80 : vector<1x8x384xf32> to vector<8x384xf32>
    %c0_26 = arith.constant 0 : index
    %c0_27 = arith.constant 0 : index
    %82 = vector.load %arg4[%c0_26, %c0_27] : memref<128x384xf32, #tpu.memory_space<vmem>>, vector<128x384xf32>
    %cst_28 = arith.constant dense<0.000000e+00> : vector<8x384xf32>
    %83 = tpu.matmul %74, %82, %cst_28 {dimension_numbers = #tpu.dot_dimension_numbers<[1], [0], [0], [1], [0, 0, 1, 1], [], []>} : vector<8x128xf32>, vector<128x384xf32>, vector<8x384xf32> -> vector<8x384xf32>
    %84 = vector.extract_strided_slice %81 {offsets = [0, 0], sizes = [8, 128], strides = [1, 1]} : vector<8x384xf32> to vector<8x128xf32>
    %85 = vector.extract_strided_slice %83 {offsets = [0, 0], sizes = [8, 128], strides = [1, 1]} : vector<8x384xf32> to vector<8x128xf32>
    %86 = arith.addf %84, %85 : vector<8x128xf32>
    %87 = arith.negf %86 : vector<8x128xf32>
    %88 = math.exp %87 : vector<8x128xf32>
    %cst_29 = arith.constant 1.000000e+00 : f32
    %89 = vector.broadcast %cst_29 : f32 to vector<8x128xf32>
    %90 = arith.addf %89, %88 : vector<8x128xf32>
    %91 = arith.divf %89, %90 : vector<8x128xf32>
    %92 = vector.extract_strided_slice %81 {offsets = [0, 128], sizes = [8, 128], strides = [1, 1]} : vector<8x384xf32> to vector<8x128xf32>
    %93 = vector.extract_strided_slice %83 {offsets = [0, 128], sizes = [8, 128], strides = [1, 1]} : vector<8x384xf32> to vector<8x128xf32>
    %94 = arith.addf %92, %93 : vector<8x128xf32>
    %95 = arith.negf %94 : vector<8x128xf32>
    %96 = math.exp %95 : vector<8x128xf32>
    %cst_30 = arith.constant 1.000000e+00 : f32
    %97 = vector.broadcast %cst_30 : f32 to vector<8x128xf32>
    %98 = arith.addf %97, %96 : vector<8x128xf32>
    %99 = arith.divf %97, %98 : vector<8x128xf32>
    %100 = vector.extract_strided_slice %81 {offsets = [0, 256], sizes = [8, 128], strides = [1, 1]} : vector<8x384xf32> to vector<8x128xf32>
    %101 = vector.extract_strided_slice %83 {offsets = [0, 256], sizes = [8, 128], strides = [1, 1]} : vector<8x384xf32> to vector<8x128xf32>
    %102 = vector.broadcast %3 : vector<1x128xf32> to vector<8x128xf32>
    %103 = arith.addf %101, %102 : vector<8x128xf32>
    %104 = arith.mulf %91, %103 : vector<8x128xf32>
    %105 = arith.addf %100, %104 : vector<8x128xf32>
    %106 = math.tanh %105 : vector<8x128xf32>
    %cst_31 = arith.constant 1.000000e+00 : f32
    %107 = vector.broadcast %cst_31 : f32 to vector<8x128xf32>
    %108 = arith.subf %107, %99 : vector<8x128xf32>
    %109 = arith.mulf %108, %106 : vector<8x128xf32>
    %110 = arith.mulf %99, %74 : vector<8x128xf32>
    %111 = arith.addf %109, %110 : vector<8x128xf32>
    %112 = arith.index_cast %c2_i32 : i32 to index
    %c0_32 = arith.constant 0 : index
    %c0_33 = arith.constant 0 : index
    %113 = vector.load %arg6[%112, %c0_32, %c0_33] : memref<8x8x128xf32, #tpu.memory_space<vmem>>, vector<1x8x128xf32>
    %114 = vector.shape_cast %113 : vector<1x8x128xf32> to vector<8x128xf32>
    %115 = vector.shape_cast %111 : vector<8x128xf32> to vector<1x8x128xf32>
    tpu.vector_store %arg6[%112, %c0_32, %c0_33], %115 {strides = array<i32>} : memref<8x8x128xf32, #tpu.memory_space<vmem>>, vector<1x8x128xf32>,
    %c3_i32 = arith.constant 3 : i32
    %116 = arith.index_cast %c3_i32 : i32 to index
    %c0_34 = arith.constant 0 : index
    %c0_35 = arith.constant 0 : index
    %117 = vector.load %arg2[%116, %c0_34, %c0_35] : memref<8x8x384xf32, #tpu.memory_space<vmem>>, vector<1x8x384xf32>
    %118 = vector.shape_cast %117 : vector<1x8x384xf32> to vector<8x384xf32>
    %c0_36 = arith.constant 0 : index
    %c0_37 = arith.constant 0 : index
    %119 = vector.load %arg4[%c0_36, %c0_37] : memref<128x384xf32, #tpu.memory_space<vmem>>, vector<128x384xf32>
    %cst_38 = arith.constant dense<0.000000e+00> : vector<8x384xf32>
    %120 = tpu.matmul %111, %119, %cst_38 {dimension_numbers = #tpu.dot_dimension_numbers<[1], [0], [0], [1], [0, 0, 1, 1], [], []>} : vector<8x128xf32>, vector<128x384xf32>, vector<8x384xf32> -> vector<8x384xf32>
    %121 = vector.extract_strided_slice %118 {offsets = [0, 0], sizes = [8, 128], strides = [1, 1]} : vector<8x384xf32> to vector<8x128xf32>
    %122 = vector.extract_strided_slice %120 {offsets = [0, 0], sizes = [8, 128], strides = [1, 1]} : vector<8x384xf32> to vector<8x128xf32>
    %123 = arith.addf %121, %122 : vector<8x128xf32>
    %124 = arith.negf %123 : vector<8x128xf32>
    %125 = math.exp %124 : vector<8x128xf32>
    %cst_39 = arith.constant 1.000000e+00 : f32
    %126 = vector.broadcast %cst_39 : f32 to vector<8x128xf32>
    %127 = arith.addf %126, %125 : vector<8x128xf32>
    %128 = arith.divf %126, %127 : vector<8x128xf32>
    %129 = vector.extract_strided_slice %118 {offsets = [0, 128], sizes = [8, 128], strides = [1, 1]} : vector<8x384xf32> to vector<8x128xf32>
    %130 = vector.extract_strided_slice %120 {offsets = [0, 128], sizes = [8, 128], strides = [1, 1]} : vector<8x384xf32> to vector<8x128xf32>
    %131 = arith.addf %129, %130 : vector<8x128xf32>
    %132 = arith.negf %131 : vector<8x128xf32>
    %133 = math.exp %132 : vector<8x128xf32>
    %cst_40 = arith.constant 1.000000e+00 : f32
    %134 = vector.broadcast %cst_40 : f32 to vector<8x128xf32>
    %135 = arith.addf %134, %133 : vector<8x128xf32>
    %136 = arith.divf %134, %135 : vector<8x128xf32>
    %137 = vector.extract_strided_slice %118 {offsets = [0, 256], sizes = [8, 128], strides = [1, 1]} : vector<8x384xf32> to vector<8x128xf32>
    %138 = vector.extract_strided_slice %120 {offsets = [0, 256], sizes = [8, 128], strides = [1, 1]} : vector<8x384xf32> to vector<8x128xf32>
    %139 = vector.broadcast %3 : vector<1x128xf32> to vector<8x128xf32>
    %140 = arith.addf %138, %139 : vector<8x128xf32>
    %141 = arith.mulf %128, %140 : vector<8x128xf32>
    %142 = arith.addf %137, %141 : vector<8x128xf32>
    %143 = math.tanh %142 : vector<8x128xf32>
    %cst_41 = arith.constant 1.000000e+00 : f32
    %144 = vector.broadcast %cst_41 : f32 to vector<8x128xf32>
    %145 = arith.subf %144, %136 : vector<8x128xf32>
    %146 = arith.mulf %145, %143 : vector<8x128xf32>
    %147 = arith.mulf %136, %111 : vector<8x128xf32>
    %148 = arith.addf %146, %147 : vector<8x128xf32>
    %149 = arith.index_cast %c3_i32 : i32 to index
    %c0_42 = arith.constant 0 : index
    %c0_43 = arith.constant 0 : index
    %150 = vector.load %arg6[%149, %c0_42, %c0_43] : memref<8x8x128xf32, #tpu.memory_space<vmem>>, vector<1x8x128xf32>
    %151 = vector.shape_cast %150 : vector<1x8x128xf32> to vector<8x128xf32>
    %152 = vector.shape_cast %148 : vector<8x128xf32> to vector<1x8x128xf32>
    tpu.vector_store %arg6[%149, %c0_42, %c0_43], %152 {strides = array<i32>} : memref<8x8x128xf32, #tpu.memory_space<vmem>>, vector<1x8x128xf32>,
    %c4_i32 = arith.constant 4 : i32
    %153 = arith.index_cast %c4_i32 : i32 to index
    %c0_44 = arith.constant 0 : index
    %c0_45 = arith.constant 0 : index
    %154 = vector.load %arg2[%153, %c0_44, %c0_45] : memref<8x8x384xf32, #tpu.memory_space<vmem>>, vector<1x8x384xf32>
    %155 = vector.shape_cast %154 : vector<1x8x384xf32> to vector<8x384xf32>
    %c0_46 = arith.constant 0 : index
    %c0_47 = arith.constant 0 : index
    %156 = vector.load %arg4[%c0_46, %c0_47] : memref<128x384xf32, #tpu.memory_space<vmem>>, vector<128x384xf32>
    %cst_48 = arith.constant dense<0.000000e+00> : vector<8x384xf32>
    %157 = tpu.matmul %148, %156, %cst_48 {dimension_numbers = #tpu.dot_dimension_numbers<[1], [0], [0], [1], [0, 0, 1, 1], [], []>} : vector<8x128xf32>, vector<128x384xf32>, vector<8x384xf32> -> vector<8x384xf32>
    %158 = vector.extract_strided_slice %155 {offsets = [0, 0], sizes = [8, 128], strides = [1, 1]} : vector<8x384xf32> to vector<8x128xf32>
    %159 = vector.extract_strided_slice %157 {offsets = [0, 0], sizes = [8, 128], strides = [1, 1]} : vector<8x384xf32> to vector<8x128xf32>
    %160 = arith.addf %158, %159 : vector<8x128xf32>
    %161 = arith.negf %160 : vector<8x128xf32>
    %162 = math.exp %161 : vector<8x128xf32>
    %cst_49 = arith.constant 1.000000e+00 : f32
    %163 = vector.broadcast %cst_49 : f32 to vector<8x128xf32>
    %164 = arith.addf %163, %162 : vector<8x128xf32>
    %165 = arith.divf %163, %164 : vector<8x128xf32>
    %166 = vector.extract_strided_slice %155 {offsets = [0, 128], sizes = [8, 128], strides = [1, 1]} : vector<8x384xf32> to vector<8x128xf32>
    %167 = vector.extract_strided_slice %157 {offsets = [0, 128], sizes = [8, 128], strides = [1, 1]} : vector<8x384xf32> to vector<8x128xf32>
    %168 = arith.addf %166, %167 : vector<8x128xf32>
    %169 = arith.negf %168 : vector<8x128xf32>
    %170 = math.exp %169 : vector<8x128xf32>
    %cst_50 = arith.constant 1.000000e+00 : f32
    %171 = vector.broadcast %cst_50 : f32 to vector<8x128xf32>
    %172 = arith.addf %171, %170 : vector<8x128xf32>
    %173 = arith.divf %171, %172 : vector<8x128xf32>
    %174 = vector.extract_strided_slice %155 {offsets = [0, 256], sizes = [8, 128], strides = [1, 1]} : vector<8x384xf32> to vector<8x128xf32>
    %175 = vector.extract_strided_slice %157 {offsets = [0, 256], sizes = [8, 128], strides = [1, 1]} : vector<8x384xf32> to vector<8x128xf32>
    %176 = vector.broadcast %3 : vector<1x128xf32> to vector<8x128xf32>
    %177 = arith.addf %175, %176 : vector<8x128xf32>
    %178 = arith.mulf %165, %177 : vector<8x128xf32>
    %179 = arith.addf %174, %178 : vector<8x128xf32>
    %180 = math.tanh %179 : vector<8x128xf32>
    %cst_51 = arith.constant 1.000000e+00 : f32
    %181 = vector.broadcast %cst_51 : f32 to vector<8x128xf32>
    %182 = arith.subf %181, %173 : vector<8x128xf32>
    %183 = arith.mulf %182, %180 : vector<8x128xf32>
    %184 = arith.mulf %173, %148 : vector<8x128xf32>
    %185 = arith.addf %183, %184 : vector<8x128xf32>
    %186 = arith.index_cast %c4_i32 : i32 to index
    %c0_52 = arith.constant 0 : index
    %c0_53 = arith.constant 0 : index
    %187 = vector.load %arg6[%186, %c0_52, %c0_53] : memref<8x8x128xf32, #tpu.memory_space<vmem>>, vector<1x8x128xf32>
    %188 = vector.shape_cast %187 : vector<1x8x128xf32> to vector<8x128xf32>
    %189 = vector.shape_cast %185 : vector<8x128xf32> to vector<1x8x128xf32>
    tpu.vector_store %arg6[%186, %c0_52, %c0_53], %189 {strides = array<i32>} : memref<8x8x128xf32, #tpu.memory_space<vmem>>, vector<1x8x128xf32>,
    %c5_i32 = arith.constant 5 : i32
    %190 = arith.index_cast %c5_i32 : i32 to index
    %c0_54 = arith.constant 0 : index
    %c0_55 = arith.constant 0 : index
    %191 = vector.load %arg2[%190, %c0_54, %c0_55] : memref<8x8x384xf32, #tpu.memory_space<vmem>>, vector<1x8x384xf32>
    %192 = vector.shape_cast %191 : vector<1x8x384xf32> to vector<8x384xf32>
    %c0_56 = arith.constant 0 : index
    %c0_57 = arith.constant 0 : index
    %193 = vector.load %arg4[%c0_56, %c0_57] : memref<128x384xf32, #tpu.memory_space<vmem>>, vector<128x384xf32>
    %cst_58 = arith.constant dense<0.000000e+00> : vector<8x384xf32>
    %194 = tpu.matmul %185, %193, %cst_58 {dimension_numbers = #tpu.dot_dimension_numbers<[1], [0], [0], [1], [0, 0, 1, 1], [], []>} : vector<8x128xf32>, vector<128x384xf32>, vector<8x384xf32> -> vector<8x384xf32>
    %195 = vector.extract_strided_slice %192 {offsets = [0, 0], sizes = [8, 128], strides = [1, 1]} : vector<8x384xf32> to vector<8x128xf32>
    %196 = vector.extract_strided_slice %194 {offsets = [0, 0], sizes = [8, 128], strides = [1, 1]} : vector<8x384xf32> to vector<8x128xf32>
    %197 = arith.addf %195, %196 : vector<8x128xf32>
    %198 = arith.negf %197 : vector<8x128xf32>
    %199 = math.exp %198 : vector<8x128xf32>
    %cst_59 = arith.constant 1.000000e+00 : f32
    %200 = vector.broadcast %cst_59 : f32 to vector<8x128xf32>
    %201 = arith.addf %200, %199 : vector<8x128xf32>
    %202 = arith.divf %200, %201 : vector<8x128xf32>
    %203 = vector.extract_strided_slice %192 {offsets = [0, 128], sizes = [8, 128], strides = [1, 1]} : vector<8x384xf32> to vector<8x128xf32>
    %204 = vector.extract_strided_slice %194 {offsets = [0, 128], sizes = [8, 128], strides = [1, 1]} : vector<8x384xf32> to vector<8x128xf32>
    %205 = arith.addf %203, %204 : vector<8x128xf32>
    %206 = arith.negf %205 : vector<8x128xf32>
    %207 = math.exp %206 : vector<8x128xf32>
    %cst_60 = arith.constant 1.000000e+00 : f32
    %208 = vector.broadcast %cst_60 : f32 to vector<8x128xf32>
    %209 = arith.addf %208, %207 : vector<8x128xf32>
    %210 = arith.divf %208, %209 : vector<8x128xf32>
    %211 = vector.extract_strided_slice %192 {offsets = [0, 256], sizes = [8, 128], strides = [1, 1]} : vector<8x384xf32> to vector<8x128xf32>
    %212 = vector.extract_strided_slice %194 {offsets = [0, 256], sizes = [8, 128], strides = [1, 1]} : vector<8x384xf32> to vector<8x128xf32>
    %213 = vector.broadcast %3 : vector<1x128xf32> to vector<8x128xf32>
    %214 = arith.addf %212, %213 : vector<8x128xf32>
    %215 = arith.mulf %202, %214 : vector<8x128xf32>
    %216 = arith.addf %211, %215 : vector<8x128xf32>
    %217 = math.tanh %216 : vector<8x128xf32>
    %cst_61 = arith.constant 1.000000e+00 : f32
    %218 = vector.broadcast %cst_61 : f32 to vector<8x128xf32>
    %219 = arith.subf %218, %210 : vector<8x128xf32>
    %220 = arith.mulf %219, %217 : vector<8x128xf32>
    %221 = arith.mulf %210, %185 : vector<8x128xf32>
    %222 = arith.addf %220, %221 : vector<8x128xf32>
    %223 = arith.index_cast %c5_i32 : i32 to index
    %c0_62 = arith.constant 0 : index
    %c0_63 = arith.constant 0 : index
    %224 = vector.load %arg6[%223, %c0_62, %c0_63] : memref<8x8x128xf32, #tpu.memory_space<vmem>>, vector<1x8x128xf32>
    %225 = vector.shape_cast %224 : vector<1x8x128xf32> to vector<8x128xf32>
    %226 = vector.shape_cast %222 : vector<8x128xf32> to vector<1x8x128xf32>
    tpu.vector_store %arg6[%223, %c0_62, %c0_63], %226 {strides = array<i32>} : memref<8x8x128xf32, #tpu.memory_space<vmem>>, vector<1x8x128xf32>,
    %c6_i32 = arith.constant 6 : i32
    %227 = arith.index_cast %c6_i32 : i32 to index
    %c0_64 = arith.constant 0 : index
    %c0_65 = arith.constant 0 : index
    %228 = vector.load %arg2[%227, %c0_64, %c0_65] : memref<8x8x384xf32, #tpu.memory_space<vmem>>, vector<1x8x384xf32>
    %229 = vector.shape_cast %228 : vector<1x8x384xf32> to vector<8x384xf32>
    %c0_66 = arith.constant 0 : index
    %c0_67 = arith.constant 0 : index
    %230 = vector.load %arg4[%c0_66, %c0_67] : memref<128x384xf32, #tpu.memory_space<vmem>>, vector<128x384xf32>
    %cst_68 = arith.constant dense<0.000000e+00> : vector<8x384xf32>
    %231 = tpu.matmul %222, %230, %cst_68 {dimension_numbers = #tpu.dot_dimension_numbers<[1], [0], [0], [1], [0, 0, 1, 1], [], []>} : vector<8x128xf32>, vector<128x384xf32>, vector<8x384xf32> -> vector<8x384xf32>
    %232 = vector.extract_strided_slice %229 {offsets = [0, 0], sizes = [8, 128], strides = [1, 1]} : vector<8x384xf32> to vector<8x128xf32>
    %233 = vector.extract_strided_slice %231 {offsets = [0, 0], sizes = [8, 128], strides = [1, 1]} : vector<8x384xf32> to vector<8x128xf32>
    %234 = arith.addf %232, %233 : vector<8x128xf32>
    %235 = arith.negf %234 : vector<8x128xf32>
    %236 = math.exp %235 : vector<8x128xf32>
    %cst_69 = arith.constant 1.000000e+00 : f32
    %237 = vector.broadcast %cst_69 : f32 to vector<8x128xf32>
    %238 = arith.addf %237, %236 : vector<8x128xf32>
    %239 = arith.divf %237, %238 : vector<8x128xf32>
    %240 = vector.extract_strided_slice %229 {offsets = [0, 128], sizes = [8, 128], strides = [1, 1]} : vector<8x384xf32> to vector<8x128xf32>
    %241 = vector.extract_strided_slice %231 {offsets = [0, 128], sizes = [8, 128], strides = [1, 1]} : vector<8x384xf32> to vector<8x128xf32>
    %242 = arith.addf %240, %241 : vector<8x128xf32>
    %243 = arith.negf %242 : vector<8x128xf32>
    %244 = math.exp %243 : vector<8x128xf32>
    %cst_70 = arith.constant 1.000000e+00 : f32
    %245 = vector.broadcast %cst_70 : f32 to vector<8x128xf32>
    %246 = arith.addf %245, %244 : vector<8x128xf32>
    %247 = arith.divf %245, %246 : vector<8x128xf32>
    %248 = vector.extract_strided_slice %229 {offsets = [0, 256], sizes = [8, 128], strides = [1, 1]} : vector<8x384xf32> to vector<8x128xf32>
    %249 = vector.extract_strided_slice %231 {offsets = [0, 256], sizes = [8, 128], strides = [1, 1]} : vector<8x384xf32> to vector<8x128xf32>
    %250 = vector.broadcast %3 : vector<1x128xf32> to vector<8x128xf32>
    %251 = arith.addf %249, %250 : vector<8x128xf32>
    %252 = arith.mulf %239, %251 : vector<8x128xf32>
    %253 = arith.addf %248, %252 : vector<8x128xf32>
    %254 = math.tanh %253 : vector<8x128xf32>
    %cst_71 = arith.constant 1.000000e+00 : f32
    %255 = vector.broadcast %cst_71 : f32 to vector<8x128xf32>
    %256 = arith.subf %255, %247 : vector<8x128xf32>
    %257 = arith.mulf %256, %254 : vector<8x128xf32>
    %258 = arith.mulf %247, %222 : vector<8x128xf32>
    %259 = arith.addf %257, %258 : vector<8x128xf32>
    %260 = arith.index_cast %c6_i32 : i32 to index
    %c0_72 = arith.constant 0 : index
    %c0_73 = arith.constant 0 : index
    %261 = vector.load %arg6[%260, %c0_72, %c0_73] : memref<8x8x128xf32, #tpu.memory_space<vmem>>, vector<1x8x128xf32>
    %262 = vector.shape_cast %261 : vector<1x8x128xf32> to vector<8x128xf32>
    %263 = vector.shape_cast %259 : vector<8x128xf32> to vector<1x8x128xf32>
    tpu.vector_store %arg6[%260, %c0_72, %c0_73], %263 {strides = array<i32>} : memref<8x8x128xf32, #tpu.memory_space<vmem>>, vector<1x8x128xf32>,
    %c7_i32 = arith.constant 7 : i32
    %264 = arith.index_cast %c7_i32 : i32 to index
    %c0_74 = arith.constant 0 : index
    %c0_75 = arith.constant 0 : index
    %265 = vector.load %arg2[%264, %c0_74, %c0_75] : memref<8x8x384xf32, #tpu.memory_space<vmem>>, vector<1x8x384xf32>
    %266 = vector.shape_cast %265 : vector<1x8x384xf32> to vector<8x384xf32>
    %c0_76 = arith.constant 0 : index
    %c0_77 = arith.constant 0 : index
    %267 = vector.load %arg4[%c0_76, %c0_77] : memref<128x384xf32, #tpu.memory_space<vmem>>, vector<128x384xf32>
    %cst_78 = arith.constant dense<0.000000e+00> : vector<8x384xf32>
    %268 = tpu.matmul %259, %267, %cst_78 {dimension_numbers = #tpu.dot_dimension_numbers<[1], [0], [0], [1], [0, 0, 1, 1], [], []>} : vector<8x128xf32>, vector<128x384xf32>, vector<8x384xf32> -> vector<8x384xf32>
    %269 = vector.extract_strided_slice %266 {offsets = [0, 0], sizes = [8, 128], strides = [1, 1]} : vector<8x384xf32> to vector<8x128xf32>
    %270 = vector.extract_strided_slice %268 {offsets = [0, 0], sizes = [8, 128], strides = [1, 1]} : vector<8x384xf32> to vector<8x128xf32>
    %271 = arith.addf %269, %270 : vector<8x128xf32>
    %272 = arith.negf %271 : vector<8x128xf32>
    %273 = math.exp %272 : vector<8x128xf32>
    %cst_79 = arith.constant 1.000000e+00 : f32
    %274 = vector.broadcast %cst_79 : f32 to vector<8x128xf32>
    %275 = arith.addf %274, %273 : vector<8x128xf32>
    %276 = arith.divf %274, %275 : vector<8x128xf32>
    %277 = vector.extract_strided_slice %266 {offsets = [0, 128], sizes = [8, 128], strides = [1, 1]} : vector<8x384xf32> to vector<8x128xf32>
    %278 = vector.extract_strided_slice %268 {offsets = [0, 128], sizes = [8, 128], strides = [1, 1]} : vector<8x384xf32> to vector<8x128xf32>
    %279 = arith.addf %277, %278 : vector<8x128xf32>
    %280 = arith.negf %279 : vector<8x128xf32>
    %281 = math.exp %280 : vector<8x128xf32>
    %cst_80 = arith.constant 1.000000e+00 : f32
    %282 = vector.broadcast %cst_80 : f32 to vector<8x128xf32>
    %283 = arith.addf %282, %281 : vector<8x128xf32>
    %284 = arith.divf %282, %283 : vector<8x128xf32>
    %285 = vector.extract_strided_slice %266 {offsets = [0, 256], sizes = [8, 128], strides = [1, 1]} : vector<8x384xf32> to vector<8x128xf32>
    %286 = vector.extract_strided_slice %268 {offsets = [0, 256], sizes = [8, 128], strides = [1, 1]} : vector<8x384xf32> to vector<8x128xf32>
    %287 = vector.broadcast %3 : vector<1x128xf32> to vector<8x128xf32>
    %288 = arith.addf %286, %287 : vector<8x128xf32>
    %289 = arith.mulf %276, %288 : vector<8x128xf32>
    %290 = arith.addf %285, %289 : vector<8x128xf32>
    %291 = math.tanh %290 : vector<8x128xf32>
    %cst_81 = arith.constant 1.000000e+00 : f32
    %292 = vector.broadcast %cst_81 : f32 to vector<8x128xf32>
    %293 = arith.subf %292, %284 : vector<8x128xf32>
    %294 = arith.mulf %293, %291 : vector<8x128xf32>
    %295 = arith.mulf %284, %259 : vector<8x128xf32>
    %296 = arith.addf %294, %295 : vector<8x128xf32>
    %297 = arith.index_cast %c7_i32 : i32 to index
    %c0_82 = arith.constant 0 : index
    %c0_83 = arith.constant 0 : index
    %298 = vector.load %arg6[%297, %c0_82, %c0_83] : memref<8x8x128xf32, #tpu.memory_space<vmem>>, vector<1x8x128xf32>
    %299 = vector.shape_cast %298 : vector<1x8x128xf32> to vector<8x128xf32>
    %300 = vector.shape_cast %296 : vector<8x128xf32> to vector<1x8x128xf32>
    tpu.vector_store %arg6[%297, %c0_82, %c0_83], %300 {strides = array<i32>} : memref<8x8x128xf32, #tpu.memory_space<vmem>>, vector<1x8x128xf32>,
    %c8_i32 = arith.constant 8 : i32
    %c0_84 = arith.constant 0 : index
    %c0_85 = arith.constant 0 : index
    %301 = vector.load %arg7[%c0_84, %c0_85] : memref<8x128xf32, #tpu.memory_space<vmem>>, vector<8x128xf32>
    tpu.vector_store %arg7[%c0_84, %c0_85], %296 {strides = array<i32>} : memref<8x128xf32, #tpu.memory_space<vmem>>, vector<8x128xf32>,
    return
  }
  func.func @transform_0(%arg0: i32, %arg1: i32) -> (i32, i32, i32) {
    %c0_i32 = arith.constant 0 : i32
    %c0_i32_0 = arith.constant 0 : i32
    return %arg1, %arg0, %c0_i32 : i32, i32, i32
  }
  func.func @transform_1(%arg0: i32, %arg1: i32) -> (i32, i32, i32) {
    %c0_i32 = arith.constant 0 : i32
    %c0_i32_0 = arith.constant 0 : i32
    %c0_i32_1 = arith.constant 0 : i32
    return %c0_i32, %arg0, %c0_i32_0 : i32, i32, i32
  }
  func.func @transform_2(%arg0: i32, %arg1: i32) -> (i32, i32) {
    %c0_i32 = arith.constant 0 : i32
    %c0_i32_0 = arith.constant 0 : i32
    %c0_i32_1 = arith.constant 0 : i32
    return %c0_i32, %c0_i32_0 : i32, i32
  }
  func.func @transform_3(%arg0: i32, %arg1: i32) -> (i32, i32) {
    %c0_i32 = arith.constant 0 : i32
    %c0_i32_0 = arith.constant 0 : i32
    %c0_i32_1 = arith.constant 0 : i32
    return %c0_i32, %c0_i32_0 : i32, i32
  }
  func.func @transform_4(%arg0: i32, %arg1: i32) -> (i32, i32, i32) {
    %c0_i32 = arith.constant 0 : i32
    %c0_i32_0 = arith.constant 0 : i32
    return %arg1, %arg0, %c0_i32 : i32, i32, i32
  }
}

</mosaic_0001>

<bundles_post_ra>
// kernel: tpu_custom_call.1
= control target key start
LH: loop header
LB: loop body
LE: loop exit
PB: predicated region body
PF: predicated region fallthrough
CT: control target
= control target key end

     0   :  { %9 = vsyncpa [#allocation4], 0  ;;  %s3411_s0 = inlined_call_operand.hbm [shape: f32[8,8,384], index: 0, kind: input, shape index: {}]   ;;  %s3412_s1 = inlined_call_operand.hbm [shape: f32[1,8,128], index: 1, kind: input, shape index: {}]   ;;  %s3413_s2 = inlined_call_operand.hbm [shape: f32[128,384], index: 2, kind: input, shape index: {}]   ;;  %s3414_s3 = inlined_call_operand.vmem [shape: f32[1,128], index: 3, kind: input, shape index: {}]   ;;  %s3415_s4 = inlined_call_operand.hbm [shape: f32[8,8,128], index: 4, kind: output, shape index: {}]  }
   0x1   :  { %10 = vsyncpa [#allocation7], 0 }
   0x2   :  { %11 = vsyncpa [#allocation5], 0  ;;  %s2890_s15 = smov [#allocation6]   ;;  %s2891_s17 = smov [#allocation3]  }
   0x3   :  { %s30_s16 = sshll.u32 %s2890_s15, 4  ;;  %s17_s18 = sshll.u32 %s2891_s17, 4  ;;  %s31_s16 = int_to_ptr.vmem [resolvable:$true] %s30_s16  ;;  %s2926_s18 = int_to_ptr.vmem [resolvable:$true] %s17_s18 }
   0x4   :  { %s2796_s21 = scalar_lea.hbm %s3412_s1, 128 }
   0x5   :  { %p2797_p0 = scmp.ne.s32.totalorder %s3412_s1, %s2796_s21  ;;  %p2800_p1 = scmp.lt.u32.totalorder %s2796_s21, %s3412_s1 }
   0x7   :  { %p2802_p2 = pnand %p2800_p1, %p2797_p0 }
   0x9   :  { %2805 = shalt.err (!%p2802_p2)
}
   0xa   :  { %s2806_s26 = scalar_lea.vmem %s31_s16, 128  ;;  %p2811_p4 = scmp.lt.s32.totalorder %s31_s16, %s31_s16 }
   0xb   :  { %p2807_p3 = scmp.ne.s32.totalorder %s31_s16, %s2806_s26  ;;  %p2812_p5 = scmp.lt.s32.totalorder %s2806_s26, %s2806_s26 }
   0xd   :  { %p2813_p6 = por %p2812_p5, %p2811_p4 }
   0xf   :  { %p2814_p7 = pnand %p2813_p6, %p2807_p3 }
  0x11   :  { %2817 = shalt.err (!%p2814_p7)
}
  0x12   :  { %33 = dma.hbm_to_vmem [thread:$0]  %s3412_s1, 128, %s31_s16, [#allocation7]  }
  0x13   :  { %s2818_s5 = scalar_lea.hbm %s3411_s0, 3072 }
  0x14   :  { %p2819_p8 = scmp.ne.s32.totalorder %s3411_s0, %s2818_s5  ;;  %p2822_p9 = scmp.lt.u32.totalorder %s2818_s5, %s3411_s0 }
  0x16   :  { %p2824_p10 = pnand %p2822_p9, %p2819_p8 }
  0x18   :  { %2827 = shalt.err (!%p2824_p10)
}
  0x19   :  { %s2828_s10 = scalar_lea.vmem %s2926_s18, 3072  ;;  %p2833_p12 = scmp.lt.s32.totalorder %s2926_s18, %s2926_s18 }
  0x1a   :  { %p2829_p11 = scmp.ne.s32.totalorder %s2926_s18, %s2828_s10  ;;  %p2834_p13 = scmp.lt.s32.totalorder %s2828_s10, %s2828_s10 }
  0x1c   :  { %p2835_p0 = por %p2834_p13, %p2833_p12 }
  0x1e   :  { %p2836_p1 = pnand %p2835_p0, %p2829_p11 }
  0x20   :  { %2839 = shalt.err (!%p2836_p1)
}
  0x21   :  { %s2892_s1 = smov 384   ;;  %s2893_s11 = smov 24  }
  0x22   :  { %23 = dma.hbm_to_vmem [thread:$0]  %s3411_s0, 3072, %s2926_s18, [#allocation4], %s2892_s1, %s2892_s1, %s2893_s11  }
  0x23   :  { %s2894_s14 = smov [#allocation8]   ;;  %s2840_s19 = scalar_lea.hbm %s3413_s2, 6144 }
  0x24   :  { %s39_s15 = sshll.u32 %s2894_s14, 4  ;;  %p2841_p2 = scmp.ne.s32.totalorder %s3413_s2, %s2840_s19  ;;  %s40_s15 = int_to_ptr.vmem [resolvable:$true] %s39_s15 }
  0x25   :  { %p2844_p3 = scmp.lt.u32.totalorder %s2840_s19, %s3413_s2 }
  0x27   :  { %p2846_p4 = pnand %p2844_p3, %p2841_p2 }
  0x29   :  { %2849 = shalt.err (!%p2846_p4)
}
  0x2a   :  { %s2850_s24 = scalar_lea.vmem %s40_s15, 6144  ;;  %p2855_p6 = scmp.lt.s32.totalorder %s40_s15, %s40_s15 }
  0x2b   :  { %p2851_p5 = scmp.ne.s32.totalorder %s40_s15, %s2850_s24  ;;  %p2856_p7 = scmp.lt.s32.totalorder %s2850_s24, %s2850_s24 }
  0x2d   :  { %p2857_p8 = por %p2856_p7, %p2855_p6 }
  0x2f   :  { %p2858_p9 = pnand %p2857_p8, %p2851_p5 }
  0x31   :  { %2861 = shalt.err (!%p2858_p9)
}
  0x32   :  { %45 = dma.hbm_to_vmem [thread:$0]  %s3413_s2, 6144, %s40_s15, [#allocation7], %s2892_s1, %s2892_s1, %s2893_s11  }
  0x33   :  { %2884 = dma.done.wait [#allocation4], 3072  }
  0x34   :  { %2885 = vsyncadd [#allocation4], 4294964224 }
  0x35   :  { %2886 = dma.done.wait [#allocation7], 6272  }
  0x36   :  { %2887 = vsyncadd [#allocation7], 4294961024  ;;  %v2895_v0 = vmov 0.0|0.0   ;;  %v2896_v1 = vmov 0.0   ;;  %vm2897_vm0 = vmmov 0   ;;  %v69_v2 = vld [vmem:[#allocation8 + $0x8] sm:$0xff] }
  0x37   :  { %2289 = vmatprep.subr.bf16.mxu1 %v2895_v0  ;;  %180 = vmatprep.mubr.f32.mxu0 %v2896_v1  ;;  %v72_v3 = vld [vmem:[#allocation8 + $0x20] sm:$0xff]  ;;  %v71_v6 = vld [vmem:[#allocation8 + $0x18] sm:$0xff]  ;;  %v78_v8 = vld [vmem:[#allocation8 + $0x50] sm:$0xff] }
  0x38   :  { %2009 = vmatprep.mubr.msk.f32.mxu1 %vm2897_vm0, %v2896_v1  ;;  %v68_v4 = vld [vmem:[#allocation8] sm:$0xff]  ;;  %v2973_v5 = vpack.c.bf16 %v72_v3, %v69_v2  ;;  %v75_v7 = vld [vmem:[#allocation8 + $0x38] sm:$0xff]  ;;  %v74_v11 = vld [vmem:[#allocation8 + $0x30] sm:$0xff] }
  0x39   :  { %v2975_v9 = vpack.c.bf16 %v71_v6, %v68_v4  ;;  %v2977_v10 = vpack.c.bf16 %v78_v8, %v75_v7  ;;  %v77_v12 = vld [vmem:[#allocation8 + $0x48] sm:$0xff]  ;;  %v84_v14 = vld [vmem:[#allocation8 + $0x80] sm:$0xff]  ;;  %v83_v18 = vld [vmem:[#allocation8 + $0x78] sm:$0xff] }
  0x3a   :  { %v81_v13 = vld [vmem:[#allocation8 + $0x68] sm:$0xff]  ;;  %2258 = vmatprep.subr.bf16.mxu0 %v2973_v5  ;;  %v2981_v15 = vpack.c.bf16 %v77_v12, %v74_v11  ;;  %v80_v17 = vld [vmem:[#allocation8 + $0x60] sm:$0xff]  ;;  %v87_v19 = vld [vmem:[#allocation8 + $0x98] sm:$0xff] }
  0x3b   :  { %2260 = vmatpush1.bf16.msra.mxu0 %v2975_v9  ;;  %v2984_v16 = vpack.c.bf16 %v84_v14, %v81_v13  ;;  %v90_v20 = vld [vmem:[#allocation8 + $0xb0] sm:$0xff]  ;;  %v2987_v21 = vpack.c.bf16 %v83_v18, %v80_v17  ;;  %v89_v24 = vld [vmem:[#allocation8 + $0xa8] sm:$0xff]  ;;  %v96_v28 = vld [vmem:[#allocation8 + $0xe0] sm:$0xff] }
  0x3c   :  { %2262 = vmatprep.subr.bf16.mxu0 %v2977_v10  ;;  %v86_v22 = vld [vmem:[#allocation8 + $0x90] sm:$0xff]  ;;  %v2990_v23 = vpack.c.bf16 %v90_v20, %v87_v19  ;;  %v73_v26 = vld [vmem:[#allocation8 + $0x28] sm:$0xff]  ;;  %v76_v30 = vld [vmem:[#allocation8 + $0x40] sm:$0xff] }
  0x3d   :  { %v70_v25 = vld [vmem:[#allocation8 + $0x10] sm:$0xff]  ;;  %v93_v27 = vld [vmem:[#allocation8 + $0xc8] sm:$0xff]  ;;  %v79_v31 = vld [vmem:[#allocation8 + $0x58] sm:$0xff]  ;;  %v2995_v32 = vpack.c.bf16 %v89_v24, %v86_v22 }
  0x3e   :  { %v2992_v29 = vpack.c.bf16 %v73_v26, %v70_v25  ;;  %v92_v33 = vld [vmem:[#allocation8 + $0xc0] sm:$0xff]  ;;  %v2998_v34 = vpack.c.bf16 %v79_v31, %v76_v30  ;;  %v3001_v35 = vpack.c.bf16 %v96_v28, %v93_v27  ;;  %v95_v36 = vld [vmem:[#allocation8 + $0xd8] sm:$0xff]  ;;  %v82_v37 = vld [vmem:[#allocation8 + $0x70] sm:$0xff] }
  0x3f   :  { %2264 = vmatpush1.bf16.msra.mxu0 %v2981_v15  ;;  %v85_v38 = vld [vmem:[#allocation8 + $0x88] sm:$0xff]  ;;  %v99_v39 = vld [vmem:[#allocation8 + $0xf8] sm:$0xff]  ;;  %v102_v40 = vld [vmem:[#allocation8 + $0x110] sm:$0xff]  ;;  %v3005_v41 = vpack.c.bf16 %v95_v36, %v92_v33 }
  0x40   :  { %2266 = vmatprep.subr.bf16.mxu0 %v2984_v16  ;;  %2291 = vmatpush3.bf16.msra.mxu1 %v2992_v29  ;;  %v98_v42 = vld [vmem:[#allocation8 + $0xf0] sm:$0xff]  ;;  %v3008_v43 = vpack.c.bf16 %v85_v38, %v82_v37  ;;  %v3011_v44 = vpack.c.bf16 %v102_v40, %v99_v39  ;;  %v101_v45 = vld [vmem:[#allocation8 + $0x108] sm:$0xff]  ;;  %v88_v46 = vld [vmem:[#allocation8 + $0xa0] sm:$0xff] }
  0x41   :  { %2292 = vmatprep.subr.bf16.mxu1 %v2895_v0  ;;  %v91_v47 = vld [vmem:[#allocation8 + $0xb8] sm:$0xff]  ;;  %v105_v48 = vld [vmem:[#allocation8 + $0x128] sm:$0xff]  ;;  %v108_v49 = vld [vmem:[#allocation8 + $0x140] sm:$0xff]  ;;  %v3015_v50 = vpack.c.bf16 %v101_v45, %v98_v42 }
  0x42   :  { %v104_v51 = vld [vmem:[#allocation8 + $0x120] sm:$0xff]  ;;  %v3018_v52 = vpack.c.bf16 %v91_v47, %v88_v46  ;;  %v3021_v53 = vpack.c.bf16 %v108_v49, %v105_v48  ;;  %v107_v54 = vld [vmem:[#allocation8 + $0x138] sm:$0xff]  ;;  %v94_v55 = vld [vmem:[#allocation8 + $0xd0] sm:$0xff] }
  0x43   :  { %2268 = vmatpush1.bf16.msra.mxu0 %v2987_v21  ;;  %v97_v56 = vld [vmem:[#allocation8 + $0xe8] sm:$0xff]  ;;  %v111_v57 = vld [vmem:[#allocation8 + $0x158] sm:$0xff]  ;;  %v114_v58 = vld [vmem:[#allocation8 + $0x170] sm:$0xff]  ;;  %v3025_v59 = vpack.c.bf16 %v107_v54, %v104_v51 }
  0x44   :  { %2270 = vmatprep.subr.bf16.mxu0 %v2990_v23  ;;  %2294 = vmatpush3.bf16.msra.mxu1 %v2998_v34  ;;  %v110_v60 = vld [vmem:[#allocation8 + $0x150] sm:$0xff]  ;;  %v3028_v61 = vpack.c.bf16 %v97_v56, %v94_v55  ;;  %v3031_v62 = vpack.c.bf16 %v114_v58, %v111_v57  ;;  %v113_v63 = vld [vmem:[#allocation8 + $0x168] sm:$0xff]  ;;  %v100_v2 = vld [vmem:[#allocation8 + $0x100] sm:$0xff] }
  0x45   :  { %2295 = vmatprep.subr.bf16.mxu1 %v2895_v0  ;;  %v103_v3 = vld [vmem:[#allocation8 + $0x118] sm:$0xff]  ;;  %v3035_v4 = vpack.c.bf16 %v113_v63, %v110_v60  ;;  %v106_v7 = vld [vmem:[#allocation8 + $0x130] sm:$0xff]  ;;  %v109_v8 = vld [vmem:[#allocation8 + $0x148] sm:$0xff] }
  0x46   :  { %v3038_v6 = vpack.c.bf16 %v103_v3, %v100_v2  ;;  %v3043_v11 = vld [vmem:[#allocation6] sm:$0xff]  ;;  %v3046_v12 = vpack.c.bf16 %v109_v8, %v106_v7  ;;  %v112_v13 = vld [vmem:[#allocation8 + $0x160] sm:$0xff]  ;;  %v67_v42 = vld [vmem:[#allocation3 + $0x10] sm:$0xff] }
  0x47   :  { %2272 = vmatpush1.bf16.msra.mxu0 %v2995_v32  ;;  %v115_v14 = vld [vmem:[#allocation8 + $0x178] sm:$0xff]  ;;  %v66_v22 = vld [vmem:[#allocation3 + $0x8] sm:$0xff]  ;;  %v287_v56 = vld [vmem:[#allocation3 + $0x18] sm:$0xff] }
  0x48   :  { %2274 = vmatprep.subr.bf16.mxu0 %v3001_v35  ;;  %2297 = vmatpush3.bf16.msra.mxu1 %v3008_v43  ;;  %v3052_v17 = vpack.c.bf16 %v115_v14, %v112_v13  ;;  %v65_v18 = vld [vmem:[#allocation3] sm:$0xff] }
  0x49   :  { %2298 = vmatprep.subr.bf16.mxu1 %v2895_v0  ;;  %v3096_v37 = vld [vmem:[%s3414_s3] ss:$0 sm:$0xff]  ;;  %s2898_s3 = smov [#allocation9]  }
  0x4a   :  { %v288_v63 = vld [vmem:[#allocation3 + $0x20] sm:$0xff]  ;;  %s1811_s26 = sshll.u32 %s2898_s3, 4  ;;  %s1812_s26 = int_to_ptr.vmem [resolvable:$true] %s1811_s26 }
  0x4b   :  { %2276 = vmatpush1.bf16.msra.mxu0 %v3005_v41  ;;  %s2862_s27 = scalar_lea.vmem %s1812_s26, 1024  ;;  %p2867_p11 = scmp.lt.s32.totalorder %s1812_s26, %s1812_s26 }
  0x4c   :  { %2278 = vmatprep.subr.bf16.mxu0 %v3011_v44  ;;  %2300 = vmatpush3.bf16.msra.mxu1 %v3018_v52  ;;  %p2863_p10 = scmp.ne.s32.totalorder %s1812_s26, %s2862_s27  ;;  %p2868_p12 = scmp.lt.s32.totalorder %s2862_s27, %s2862_s27 }
  0x4d   :  { %2301 = vmatprep.subr.bf16.mxu1 %v2895_v0 }
  0x4e   :  { %p2869_p13 = por %p2868_p12, %p2867_p11 }
  0x4f   :  { %2280 = vmatpush1.bf16.msra.mxu0 %v3015_v50 }
  0x50   :  { %2282 = vmatprep.subr.bf16.mxu0 %v3021_v53  ;;  %2303 = vmatpush3.bf16.msra.mxu1 %v3028_v61  ;;  %p2870_p0 = pnand %p2869_p13, %p2863_p10 }
  0x51   :  { %2304 = vmatprep.subr.bf16.mxu1 %v2895_v0 }
  0x53   :  { %2284 = vmatpush1.bf16.msra.mxu0 %v3025_v59 }
  0x54   :  { %2286 = vmatprep.subr.bf16.mxu0 %v3031_v62  ;;  %2306 = vmatpush3.bf16.msra.mxu1 %v3038_v6 }
  0x55   :  { %2307 = vmatprep.subr.bf16.mxu1 %v2895_v0 }
  0x57   :  { %2288 = vmatpush1.bf16.msra.mxu0 %v3035_v4 }
  0x58   :  { %2314 = vmatprep.subr.bf16.mxu0 %v2973_v5  ;;  %2309 = vmatpush3.bf16.msra.mxu1 %v3046_v12 }
  0x59   :  { %2310 = vmatprep.subr.bf16.mxu1 %v2895_v0 }
  0x5a   :  { %181 = vmatmul.mubr.f32.vlgmr.msra.gmra.mrb[0].mxu0 %v3043_v11 }
  0x5b   :  { %2316 = vmatpush1.bf16.msra.mxu0 %v2975_v9  ;;  %402 = vmatprep.mubr.f32.mxu0 %v2896_v1 }
  0x5c   :  { %2318 = vmatprep.subr.bf16.mxu0 %v2977_v10  ;;  %2312 = vmatpush3.bf16.msra.mxu1 %v3052_v17 }
  0x5d   :  { %2345 = vmatprep.subr.bf16.mxu1 %v2895_v0 }
  0x5f   :  { %2320 = vmatpush1.bf16.msra.mxu0 %v2981_v15  ;;  %2010 = vmatmul.mubr.f32.vlgmr.msra.gmra.mrb[0].mxu1 %v3043_v11 }
  0x60   :  { %2322 = vmatprep.subr.bf16.mxu0 %v2984_v16  ;;  %2347 = vmatpush3.bf16.msra.mxu1 %v2992_v29 }
  0x61   :  { %2348 = vmatprep.subr.bf16.mxu1 %v2895_v0  ;;  %2044 = vmatprep.mubr.msk.f32.mxu1 %vm2897_vm0, %v2896_v1 }
  0x63   :  { %2324 = vmatpush1.bf16.msra.mxu0 %v2987_v21 }
  0x64   :  { %2326 = vmatprep.subr.bf16.mxu0 %v2990_v23  ;;  %2350 = vmatpush3.bf16.msra.mxu1 %v2998_v34 }
  0x65   :  { %2351 = vmatprep.subr.bf16.mxu1 %v2895_v0 }
  0x67   :  { %2328 = vmatpush1.bf16.msra.mxu0 %v2995_v32 }
  0x68   :  { %2330 = vmatprep.subr.bf16.mxu0 %v3001_v35  ;;  %2353 = vmatpush3.bf16.msra.mxu1 %v3008_v43 }
  0x69   :  { %2354 = vmatprep.subr.bf16.mxu1 %v2895_v0 }
  0x6b   :  { %2332 = vmatpush1.bf16.msra.mxu0 %v3005_v41 }
  0x6c   :  { %2334 = vmatprep.subr.bf16.mxu0 %v3011_v44  ;;  %2356 = vmatpush3.bf16.msra.mxu1 %v3018_v52 }
  0x6d   :  { %2357 = vmatprep.subr.bf16.mxu1 %v2895_v0 }
  0x6f   :  { %2336 = vmatpush1.bf16.msra.mxu0 %v3015_v50 }
  0x70   :  { %2338 = vmatprep.subr.bf16.mxu0 %v3021_v53  ;;  %2359 = vmatpush3.bf16.msra.mxu1 %v3028_v61 }
  0x71   :  { %2360 = vmatprep.subr.bf16.mxu1 %v2895_v0 }
  0x73   :  { %2340 = vmatpush1.bf16.msra.mxu0 %v3025_v59 }
  0x74   :  { %2342 = vmatprep.subr.bf16.mxu0 %v3031_v62  ;;  %2362 = vmatpush3.bf16.msra.mxu1 %v3038_v6 }
  0x75   :  { %2363 = vmatprep.subr.bf16.mxu1 %v2895_v0 }
  0x77   :  { %2344 = vmatpush1.bf16.msra.mxu0 %v3035_v4 }
  0x78   :  { %2370 = vmatprep.subr.bf16.mxu0 %v2973_v5  ;;  %2365 = vmatpush3.bf16.msra.mxu1 %v3046_v12 }
  0x79   :  { %2366 = vmatprep.subr.bf16.mxu1 %v2895_v0 }
  0x7c   :  { %2368 = vmatpush3.bf16.msra.mxu1 %v3052_v17 }
  0x7d   :  { %2401 = vmatprep.subr.bf16.mxu1 %v2895_v0 }
 0x12d   :  { %v182_v19 = vpop.f32.mrb[0].mxu0 }
 0x12e   :  { %v257_v20 = vadd.f32 %v182_v19, %v65_v18  ;;  %v184_v24 = vpop.f32.mrb[1].mxu0 }
 0x12f   :  { %v264_v26 = vadd.f32 %v184_v24, %v66_v22  ;;  %v289_v22 = vld [vmem:[#allocation3 + $0x28] sm:$0xff] }
 0x130   :  { %v1824_v25 = vmul.f32 -1.442695, %v257_v20 }
 0x131   :  { %v1825_v27 = vmul.f32 -1.442695, %v264_v26 }
 0x132   :  { %2716 = vpow2.f32 %v1824_v25  ;;  %v253_v28 = vpop.f32.mrb[0].mxu1 }
 0x133   :  { %v2011_v30 = vpop.f32.mrb[1].mxu1  ;;  %2718 = vpow2.f32 %v1825_v27  ;;  %v277_v39 = vadd.f32 %v3096_v37, %v253_v28 }
 0x13c   :  { %v2717_v31 = vpop.eup %2716 }
 0x13d   :  { %v261_v33 = vadd.f32 1.0, %v2717_v31  ;;  %v2719_v36 = vpop.eup %2718 }
 0x13e   :  { %v268_v38 = vadd.f32 1.0, %v2719_v36 }
 0x13f   :  { %2720 = vrcp.f32 %v261_v33 }
 0x140   :  { %2722 = vrcp.f32 %v268_v38 }
 0x149   :  { %v2721_v40 = vpop.eup %2720 }
 0x14a   :  { %v278_v45 = vmul.f32 %v2721_v40, %v277_v39  ;;  %v2723_v47 = vpop.eup %2722 }
 0x14b   :  { %v281_v48 = vsub.f32 1.0, %v2723_v47  ;;  %v283_v54 = vmul.f32 %v2723_v47, %v3043_v11  ;;  %v945_v47 = vld [vmem:[#allocation8 + $0x20] sm:$0xff] }
 0x14c   :  { %v279_v46 = vadd.f32 %v278_v45, %v67_v42 }
 0x14e   :  { %2724 = vtanh.f32 %v279_v46 }
 0x158   :  { %v2725_v49 = vpop.eup %2724 }
 0x159   :  { %v282_v51 = vmul.f32 %v2725_v49, %v281_v48  ;;  %v941_v49 = vld [vmem:[#allocation8] sm:$0xff] }
 0x15b   :  { %v3100_v55 = vadd.f32 %v283_v54, %v282_v51 }
 0x15d   :  { %285 = vst [vmem:[#allocation9] sm:$0xff] %v3100_v55  ;;  %403 = vmatmul.mubr.f32.vlgmr.msra.gmra.mrb[2].mxu0 %v3100_v55  ;;  %2045 = vmatmul.mubr.f32.vlgmr.msra.gmra.mrb[2].mxu1 %v3100_v55 }
 0x15e   :  { %2372 = vmatpush1.bf16.msra.mxu0 %v2975_v9  ;;  %2403 = vmatpush3.bf16.msra.mxu1 %v2992_v29 }
 0x15f   :  { %2374 = vmatprep.subr.bf16.mxu0 %v2977_v10  ;;  %2404 = vmatprep.subr.bf16.mxu1 %v2895_v0 }
 0x160   :  { %619 = vmatprep.mubr.f32.mxu0 %v2896_v1  ;;  %2079 = vmatprep.mubr.msk.f32.mxu1 %vm2897_vm0, %v2896_v1 }
 0x162   :  { %2376 = vmatpush1.bf16.msra.mxu0 %v2981_v15  ;;  %2406 = vmatpush3.bf16.msra.mxu1 %v2998_v34 }
 0x163   :  { %2378 = vmatprep.subr.bf16.mxu0 %v2984_v16  ;;  %2407 = vmatprep.subr.bf16.mxu1 %v2895_v0 }
 0x166   :  { %2380 = vmatpush1.bf16.msra.mxu0 %v2987_v21  ;;  %2409 = vmatpush3.bf16.msra.mxu1 %v3008_v43 }
 0x167   :  { %2382 = vmatprep.subr.bf16.mxu0 %v2990_v23  ;;  %2410 = vmatprep.subr.bf16.mxu1 %v2895_v0 }
 0x16a   :  { %2384 = vmatpush1.bf16.msra.mxu0 %v2995_v32  ;;  %2412 = vmatpush3.bf16.msra.mxu1 %v3018_v52 }
 0x16b   :  { %2386 = vmatprep.subr.bf16.mxu0 %v3001_v35  ;;  %2413 = vmatprep.subr.bf16.mxu1 %v2895_v0 }
 0x16e   :  { %2388 = vmatpush1.bf16.msra.mxu0 %v3005_v41  ;;  %2415 = vmatpush3.bf16.msra.mxu1 %v3028_v61 }
 0x16f   :  { %2390 = vmatprep.subr.bf16.mxu0 %v3011_v44  ;;  %2416 = vmatprep.subr.bf16.mxu1 %v2895_v0 }
 0x172   :  { %2392 = vmatpush1.bf16.msra.mxu0 %v3015_v50  ;;  %2418 = vmatpush3.bf16.msra.mxu1 %v3038_v6 }
 0x173   :  { %2394 = vmatprep.subr.bf16.mxu0 %v3021_v53  ;;  %2419 = vmatprep.subr.bf16.mxu1 %v2895_v0 }
 0x176   :  { %2396 = vmatpush1.bf16.msra.mxu0 %v3025_v59  ;;  %2421 = vmatpush3.bf16.msra.mxu1 %v3046_v12 }
 0x177   :  { %2398 = vmatprep.subr.bf16.mxu0 %v3031_v62  ;;  %2422 = vmatprep.subr.bf16.mxu1 %v2895_v0 }
 0x17a   :  { %2400 = vmatpush1.bf16.msra.mxu0 %v3035_v4  ;;  %2424 = vmatpush3.bf16.msra.mxu1 %v3052_v17 }
 0x17b   :  { %2426 = vmatprep.subr.bf16.mxu0 %v2973_v5  ;;  %2457 = vmatprep.subr.bf16.mxu1 %v2895_v0 }
 0x230   :  { %v404_v57 = vpop.f32.mrb[2].mxu0  ;;  %v475_v58 = vpop.f32.mrb[2].mxu1 }
 0x231   :  { %v479_v60 = vadd.f32 %v404_v57, %v287_v56  ;;  %v406_v2 = vpop.f32.mrb[3].mxu0  ;;  %v2046_v3 = vpop.f32.mrb[3].mxu1  ;;  %v493_v5 = vadd.f32 %v3096_v37, %v475_v58  ;;  %v954_v57 = vld [vmem:[#allocation8 + $0x68] sm:$0xff]  ;;  %v957_v58 = vld [vmem:[#allocation8 + $0x80] sm:$0xff] }
 0x232   :  { %v486_v8 = vadd.f32 %v406_v2, %v288_v63  ;;  %v953_v63 = vld [vmem:[#allocation8 + $0x60] sm:$0xff]  ;;  %v956_v2 = vld [vmem:[#allocation8 + $0x78] sm:$0xff] }
 0x233   :  { %v1827_v7 = vmul.f32 -1.442695, %v479_v60  ;;  %v3213_v60 = vpack.c.bf16 %v957_v58, %v954_v57  ;;  %v3215_v3 = vpack.c.bf16 %v956_v2, %v953_v63 }
 0x234   :  { %v1828_v11 = vmul.f32 -1.442695, %v486_v8  ;;  %v963_v8 = vld [vmem:[#allocation8 + $0xb0] sm:$0xff] }
 0x235   :  { %2726 = vpow2.f32 %v1827_v7  ;;  %v960_v7 = vld [vmem:[#allocation8 + $0x98] sm:$0xff] }
 0x236   :  { %2728 = vpow2.f32 %v1828_v11  ;;  %v3219_v11 = vpack.c.bf16 %v963_v8, %v960_v7  ;;  %v723_v8 = vld [vmem:[#allocation3 + $0x58] sm:$0xff] }
 0x23f   :  { %v2727_v13 = vpop.eup %2726 }
 0x240   :  { %v483_v14 = vadd.f32 1.0, %v2727_v13  ;;  %v2729_v18 = vpop.eup %2728  ;;  %v959_v13 = vld [vmem:[#allocation8 + $0x90] sm:$0xff] }
 0x241   :  { %v490_v19 = vadd.f32 1.0, %v2729_v18 }
 0x242   :  { %2730 = vrcp.f32 %v483_v14  ;;  %v962_v14 = vld [vmem:[#allocation8 + $0xa8] sm:$0xff] }
 0x243   :  { %2732 = vrcp.f32 %v490_v19  ;;  %v3221_v18 = vpack.c.bf16 %v962_v14, %v959_v13  ;;  %v966_v19 = vld [vmem:[#allocation8 + $0xc8] sm:$0xff] }
 0x24c   :  { %v2731_v20 = vpop.eup %2730 }
 0x24d   :  { %v494_v24 = vmul.f32 %v2731_v20, %v493_v5  ;;  %v2733_v26 = vpop.eup %2732  ;;  %v969_v5 = vld [vmem:[#allocation8 + $0xe0] sm:$0xff] }
 0x24e   :  { %v497_v27 = vsub.f32 1.0, %v2733_v26  ;;  %v499_v31 = vmul.f32 %v2733_v26, %v3100_v55  ;;  %v947_v55 = vld [vmem:[#allocation8 + $0x30] sm:$0xff]  ;;  %v3225_v20 = vpack.c.bf16 %v969_v5, %v966_v19  ;;  %v972_v26 = vld [vmem:[#allocation8 + $0xf8] sm:$0xff] }
 0x24f   :  { %v495_v25 = vadd.f32 %v494_v24, %v289_v22  ;;  %v965_v22 = vld [vmem:[#allocation8 + $0xc0] sm:$0xff]  ;;  %v968_v24 = vld [vmem:[#allocation8 + $0xd8] sm:$0xff] }
 0x251   :  { %2734 = vtanh.f32 %v495_v25  ;;  %v3227_v25 = vpack.c.bf16 %v968_v24, %v965_v22 }
 0x25b   :  { %v2735_v28 = vpop.eup %2734 }
 0x25c   :  { %v498_v30 = vmul.f32 %v2735_v28, %v497_v27  ;;  %v975_v27 = vld [vmem:[#allocation8 + $0x110] sm:$0xff] }
 0x25d   :  { %v971_v28 = vld [vmem:[#allocation8 + $0xf0] sm:$0xff] }
 0x25e   :  { %v3142_v33 = vadd.f32 %v499_v31, %v498_v30  ;;  %v3231_v30 = vpack.c.bf16 %v975_v27, %v972_v26  ;;  %v974_v31 = vld [vmem:[#allocation8 + $0x108] sm:$0xff] }
 0x260   :  { %502 = vst [vmem:[#allocation9 + $0x8] sm:$0xff] %v3142_v33  ;;  %620 = vmatmul.mubr.f32.vlgmr.msra.gmra.mrb[4].mxu0 %v3142_v33  ;;  %2080 = vmatmul.mubr.f32.vlgmr.msra.gmra.mrb[4].mxu1 %v3142_v33 }
 0x261   :  { %2428 = vmatpush1.bf16.msra.mxu0 %v2975_v9  ;;  %2459 = vmatpush3.bf16.msra.mxu1 %v2992_v29  ;;  %v504_v9 = vld [vmem:[#allocation3 + $0x30] sm:$0xff] }
 0x262   :  { %2430 = vmatprep.subr.bf16.mxu0 %v2977_v10  ;;  %2460 = vmatprep.subr.bf16.mxu1 %v2895_v0 }
 0x263   :  { %836 = vmatprep.mubr.f32.mxu0 %v2896_v1  ;;  %2114 = vmatprep.mubr.msk.f32.mxu1 %vm2897_vm0, %v2896_v1 }
 0x265   :  { %2432 = vmatpush1.bf16.msra.mxu0 %v2981_v15  ;;  %2462 = vmatpush3.bf16.msra.mxu1 %v2998_v34 }
 0x266   :  { %2434 = vmatprep.subr.bf16.mxu0 %v2984_v16  ;;  %2463 = vmatprep.subr.bf16.mxu1 %v2895_v0 }
 0x269   :  { %2436 = vmatpush1.bf16.msra.mxu0 %v2987_v21  ;;  %2465 = vmatpush3.bf16.msra.mxu1 %v3008_v43  ;;  %v505_v21 = vld [vmem:[#allocation3 + $0x38] sm:$0xff] }
 0x26a   :  { %2438 = vmatprep.subr.bf16.mxu0 %v2990_v23  ;;  %2466 = vmatprep.subr.bf16.mxu1 %v2895_v0 }
 0x26d   :  { %2440 = vmatpush1.bf16.msra.mxu0 %v2995_v32  ;;  %2468 = vmatpush3.bf16.msra.mxu1 %v3018_v52 }
 0x26e   :  { %2442 = vmatprep.subr.bf16.mxu0 %v3001_v35  ;;  %2469 = vmatprep.subr.bf16.mxu1 %v2895_v0 }
 0x271   :  { %2444 = vmatpush1.bf16.msra.mxu0 %v3005_v41  ;;  %2471 = vmatpush3.bf16.msra.mxu1 %v3028_v61 }
 0x272   :  { %2446 = vmatprep.subr.bf16.mxu0 %v3011_v44  ;;  %2472 = vmatprep.subr.bf16.mxu1 %v2895_v0 }
 0x275   :  { %2448 = vmatpush1.bf16.msra.mxu0 %v3015_v50  ;;  %2474 = vmatpush3.bf16.msra.mxu1 %v3038_v6 }
 0x276   :  { %2450 = vmatprep.subr.bf16.mxu0 %v3021_v53  ;;  %2475 = vmatprep.subr.bf16.mxu1 %v2895_v0 }
 0x279   :  { %2452 = vmatpush1.bf16.msra.mxu0 %v3025_v59  ;;  %2477 = vmatpush3.bf16.msra.mxu1 %v3046_v12  ;;  %v506_v12 = vld [vmem:[#allocation3 + $0x40] sm:$0xff] }
 0x27a   :  { %2454 = vmatprep.subr.bf16.mxu0 %v3031_v62  ;;  %2478 = vmatprep.subr.bf16.mxu1 %v2895_v0 }
 0x27d   :  { %2456 = vmatpush1.bf16.msra.mxu0 %v3035_v4  ;;  %2480 = vmatpush3.bf16.msra.mxu1 %v3052_v17 }
 0x27e   :  { %2513 = vmatprep.subr.bf16.mxu1 %v2895_v0 }
 0x333   :  { %v621_v10 = vpop.f32.mrb[4].mxu0  ;;  %v692_v15 = vpop.f32.mrb[4].mxu1 }
 0x334   :  { %v696_v16 = vadd.f32 %v621_v10, %v504_v9  ;;  %v623_v23 = vpop.f32.mrb[5].mxu0  ;;  %v2081_v32 = vpop.f32.mrb[5].mxu1  ;;  %v710_v4 = vadd.f32 %v3096_v37, %v692_v15  ;;  %v976_v9 = vld [vmem:[#allocation8 + $0x118] sm:$0xff]  ;;  %v3233_v10 = vpack.c.bf16 %v974_v31, %v971_v28  ;;  %v1163_v28 = vld [vmem:[#allocation8 + $0x28] sm:$0xff] }
 0x335   :  { %v703_v41 = vadd.f32 %v623_v23, %v505_v21  ;;  %v981_v21 = vld [vmem:[#allocation8 + $0x140] sm:$0xff] }
 0x336   :  { %v1829_v35 = vmul.f32 -1.442695, %v696_v16  ;;  %v978_v16 = vld [vmem:[#allocation8 + $0x128] sm:$0xff]  ;;  %v977_v23 = vld [vmem:[#allocation8 + $0x120] sm:$0xff] }
 0x337   :  { %v1830_v44 = vmul.f32 -1.442695, %v703_v41  ;;  %v3238_v32 = vpack.c.bf16 %v981_v21, %v978_v16  ;;  %v979_v41 = vld [vmem:[#allocation8 + $0x130] sm:$0xff] }
 0x338   :  { %2736 = vpow2.f32 %v1829_v35  ;;  %v980_v35 = vld [vmem:[#allocation8 + $0x138] sm:$0xff]  ;;  %v1172_v21 = vld [vmem:[#allocation8 + $0x70] sm:$0xff] }
 0x339   :  { %2738 = vpow2.f32 %v1830_v44  ;;  %v982_v44 = vld [vmem:[#allocation8 + $0x148] sm:$0xff] }
 0x342   :  { %v2737_v50 = vpop.eup %2736 }
 0x343   :  { %v700_v53 = vadd.f32 1.0, %v2737_v50  ;;  %v2739_v59 = vpop.eup %2738  ;;  %v3242_v50 = vpack.c.bf16 %v980_v35, %v977_v23  ;;  %v1175_v23 = vld [vmem:[#allocation8 + $0x88] sm:$0xff] }
 0x344   :  { %v707_v62 = vadd.f32 1.0, %v2739_v59  ;;  %v984_v59 = vld [vmem:[#allocation8 + $0x158] sm:$0xff]  ;;  %v3296_v35 = vpack.c.bf16 %v1175_v23, %v1172_v21 }
 0x345   :  { %2740 = vrcp.f32 %v700_v53  ;;  %v3244_v53 = vpack.c.bf16 %v982_v44, %v979_v41  ;;  %v1178_v41 = vld [vmem:[#allocation8 + $0xa0] sm:$0xff]  ;;  %v1181_v44 = vld [vmem:[#allocation8 + $0xb8] sm:$0xff] }
 0x346   :  { %2742 = vrcp.f32 %v707_v62  ;;  %v987_v62 = vld [vmem:[#allocation8 + $0x170] sm:$0xff] }
 0x34f   :  { %v2741_v6 = vpop.eup %2740 }
 0x350   :  { %v711_v17 = vmul.f32 %v2741_v6, %v710_v4  ;;  %v2743_v38 = vpop.eup %2742  ;;  %v983_v4 = vld [vmem:[#allocation8 + $0x150] sm:$0xff]  ;;  %v3248_v6 = vpack.c.bf16 %v987_v62, %v984_v59  ;;  %v3300_v59 = vpack.c.bf16 %v1181_v44, %v1178_v41 }
 0x351   :  { %v714_v39 = vsub.f32 1.0, %v2743_v38  ;;  %v716_v45 = vmul.f32 %v2743_v38, %v3142_v33  ;;  %v973_v33 = vld [vmem:[#allocation8 + $0x100] sm:$0xff]  ;;  %v1184_v62 = vld [vmem:[#allocation8 + $0xd0] sm:$0xff] }
 0x352   :  { %v712_v36 = vadd.f32 %v711_v17, %v506_v12  ;;  %v3235_v15 = vpack.c.bf16 %v976_v9, %v973_v33  ;;  %v986_v12 = vld [vmem:[#allocation8 + $0x168] sm:$0xff]  ;;  %v985_v17 = vld [vmem:[#allocation8 + $0x160] sm:$0xff]  ;;  %v1169_v9 = vld [vmem:[#allocation8 + $0x58] sm:$0xff] }
 0x353   :  { %v3252_v38 = vpack.c.bf16 %v986_v12, %v983_v4  ;;  %v1166_v33 = vld [vmem:[#allocation8 + $0x40] sm:$0xff]  ;;  %v1187_v4 = vld [vmem:[#allocation8 + $0xe8] sm:$0xff] }
 0x354   :  { %2744 = vtanh.f32 %v712_v36  ;;  %v988_v36 = vld [vmem:[#allocation8 + $0x178] sm:$0xff]  ;;  %v3292_v16 = vpack.c.bf16 %v1169_v9, %v1166_v33  ;;  %v3304_v12 = vpack.c.bf16 %v1187_v4, %v1184_v62 }
 0x355   :  { %v1156_v33 = vld [vmem:[#allocation3 + $0x80] sm:$0xff] }
 0x35e   :  { %v2745_v40 = vpop.eup %2744 }
 0x35f   :  { %v715_v42 = vmul.f32 %v2745_v40, %v714_v39  ;;  %v3254_v39 = vpack.c.bf16 %v988_v36, %v985_v17  ;;  %v721_v40 = vld [vmem:[#allocation3 + $0x48] sm:$0xff]  ;;  %v938_v17 = vld [vmem:[#allocation3 + $0x60] sm:$0xff] }
 0x361   :  { %v3183_v46 = vadd.f32 %v716_v45, %v715_v42 }
 0x363   :  { %719 = vst [vmem:[#allocation9 + $0x10] sm:$0xff] %v3183_v46  ;;  %837 = vmatmul.mubr.f32.vlgmr.msra.gmra.mrb[6].mxu0 %v3183_v46  ;;  %2115 = vmatmul.mubr.f32.vlgmr.msra.gmra.mrb[6].mxu1 %v3183_v46 }
 0x364   :  { %2515 = vmatpush3.bf16.msra.mxu1 %v2992_v29  ;;  %1053 = vmatprep.mubr.f32.mxu0 %v2896_v1  ;;  %v942_v29 = vld [vmem:[#allocation8 + $0x8] sm:$0xff] }
 0x365   :  { %2516 = vmatprep.subr.bf16.mxu1 %v2895_v0  ;;  %2149 = vmatprep.mubr.msk.f32.mxu1 %vm2897_vm0, %v2896_v1  ;;  %v3201_v48 = vpack.c.bf16 %v945_v47, %v942_v29  ;;  %v722_v47 = vld [vmem:[#allocation3 + $0x50] sm:$0xff] }
 0x367   :  { %2482 = vmatprep.subr.bf16.mxu0 %v3201_v48 }
 0x368   :  { %2518 = vmatpush3.bf16.msra.mxu1 %v2998_v34  ;;  %v944_v34 = vld [vmem:[#allocation8 + $0x18] sm:$0xff] }
 0x369   :  { %2519 = vmatprep.subr.bf16.mxu1 %v2895_v0  ;;  %v3203_v51 = vpack.c.bf16 %v944_v34, %v941_v49 }
 0x36b   :  { %2484 = vmatpush1.bf16.msra.mxu0 %v3203_v51 }
 0x36c   :  { %2521 = vmatpush3.bf16.msra.mxu1 %v3008_v43  ;;  %v948_v43 = vld [vmem:[#allocation8 + $0x38] sm:$0xff] }
 0x36d   :  { %2522 = vmatprep.subr.bf16.mxu1 %v2895_v0 }
 0x370   :  { %2524 = vmatpush3.bf16.msra.mxu1 %v3018_v52  ;;  %v951_v52 = vld [vmem:[#allocation8 + $0x50] sm:$0xff] }
 0x371   :  { %2525 = vmatprep.subr.bf16.mxu1 %v2895_v0  ;;  %v3207_v54 = vpack.c.bf16 %v951_v52, %v948_v43 }
 0x373   :  { %2486 = vmatprep.subr.bf16.mxu0 %v3207_v54 }
 0x374   :  { %2527 = vmatpush3.bf16.msra.mxu1 %v3028_v61  ;;  %v950_v61 = vld [vmem:[#allocation8 + $0x48] sm:$0xff] }
 0x375   :  { %2528 = vmatprep.subr.bf16.mxu1 %v2895_v0  ;;  %v3209_v56 = vpack.c.bf16 %v950_v61, %v947_v55 }
 0x377   :  { %2488 = vmatpush1.bf16.msra.mxu0 %v3209_v56 }
 0x378   :  { %2490 = vmatprep.subr.bf16.mxu0 %v3213_v60  ;;  %2530 = vmatpush3.bf16.msra.mxu1 %v3235_v15 }
 0x379   :  { %2531 = vmatprep.subr.bf16.mxu1 %v2895_v0 }
 0x37b   :  { %2492 = vmatpush1.bf16.msra.mxu0 %v3215_v3 }
 0x37c   :  { %2494 = vmatprep.subr.bf16.mxu0 %v3219_v11  ;;  %2533 = vmatpush3.bf16.msra.mxu1 %v3244_v53 }
 0x37d   :  { %2534 = vmatprep.subr.bf16.mxu1 %v2895_v0 }
 0x37f   :  { %2496 = vmatpush1.bf16.msra.mxu0 %v3221_v18 }
 0x380   :  { %2498 = vmatprep.subr.bf16.mxu0 %v3225_v20  ;;  %2536 = vmatpush3.bf16.msra.mxu1 %v3254_v39 }
 0x381   :  { %2569 = vmatprep.subr.bf16.mxu1 %v2895_v0 }
 0x383   :  { %2500 = vmatpush1.bf16.msra.mxu0 %v3227_v25 }
 0x384   :  { %2502 = vmatprep.subr.bf16.mxu0 %v3231_v30 }
 0x387   :  { %2504 = vmatpush1.bf16.msra.mxu0 %v3233_v10 }
 0x388   :  { %2506 = vmatprep.subr.bf16.mxu0 %v3238_v32 }
 0x38b   :  { %2508 = vmatpush1.bf16.msra.mxu0 %v3242_v50 }
 0x38c   :  { %2510 = vmatprep.subr.bf16.mxu0 %v3248_v6 }
 0x38f   :  { %2512 = vmatpush1.bf16.msra.mxu0 %v3252_v38 }
 0x390   :  { %2538 = vmatprep.subr.bf16.mxu0 %v3201_v48 }
 0x436   :  { %v838_v42 = vpop.f32.mrb[6].mxu0  ;;  %v909_v45 = vpop.f32.mrb[6].mxu1 }
 0x437   :  { %v913_v29 = vadd.f32 %v838_v42, %v721_v40  ;;  %v840_v49 = vpop.f32.mrb[7].mxu0  ;;  %v2116_v34 = vpop.f32.mrb[7].mxu1  ;;  %v927_v2 = vadd.f32 %v3096_v37, %v909_v45  ;;  %v939_v45 = vld [vmem:[#allocation3 + $0x68] sm:$0xff] }
 0x438   :  { %v920_v52 = vadd.f32 %v840_v49, %v722_v47 }
 0x439   :  { %v1831_v43 = vmul.f32 -1.442695, %v913_v29 }
 0x43a   :  { %v1832_v55 = vmul.f32 -1.442695, %v920_v52 }
 0x43b   :  { %2746 = vpow2.f32 %v1831_v43 }
 0x43c   :  { %2748 = vpow2.f32 %v1832_v55 }
 0x445   :  { %v2747_v61 = vpop.eup %2746 }
 0x446   :  { %v917_v57 = vadd.f32 1.0, %v2747_v61  ;;  %v2749_v58 = vpop.eup %2748 }
 0x447   :  { %v924_v63 = vadd.f32 1.0, %v2749_v58 }
 0x448   :  { %2750 = vrcp.f32 %v917_v57 }
 0x449   :  { %2752 = vrcp.f32 %v924_v63 }
 0x452   :  { %v2751_v7 = vpop.eup %2750 }
 0x453   :  { %v928_v13 = vmul.f32 %v2751_v7, %v927_v2  ;;  %v2753_v19 = vpop.eup %2752  ;;  %v940_v2 = vld [vmem:[#allocation3 + $0x70] sm:$0xff] }
 0x454   :  { %v931_v5 = vsub.f32 1.0, %v2753_v19  ;;  %v933_v26 = vmul.f32 %v2753_v19, %v3183_v46  ;;  %v1160_v46 = vld [vmem:[#allocation8 + $0x10] sm:$0xff] }
 0x455   :  { %v929_v14 = vadd.f32 %v928_v13, %v723_v8  ;;  %v3288_v31 = vpack.c.bf16 %v1163_v28, %v1160_v46 }
 0x457   :  { %2754 = vtanh.f32 %v929_v14 }
 0x461   :  { %v2755_v22 = vpop.eup %2754 }
 0x462   :  { %v932_v24 = vmul.f32 %v2755_v22, %v931_v5 }
 0x464   :  { %v3264_v27 = vadd.f32 %v933_v26, %v932_v24  ;;  %v1155_v26 = vld [vmem:[#allocation3 + $0x78] sm:$0xff] }
 0x466   :  { %936 = vst [vmem:[#allocation9 + $0x18] sm:$0xff] %v3264_v27  ;;  %1054 = vmatmul.mubr.f32.vlgmr.msra.gmra.mrb[8].mxu0 %v3264_v27  ;;  %2150 = vmatmul.mubr.f32.vlgmr.msra.gmra.mrb[8].mxu1 %v3264_v27 }
 0x467   :  { %2540 = vmatpush1.bf16.msra.mxu0 %v3203_v51  ;;  %1270 = vmatprep.mubr.f32.mxu0 %v2896_v1 }
 0x468   :  { %2542 = vmatprep.subr.bf16.mxu0 %v3207_v54  ;;  %2184 = vmatprep.mubr.msk.f32.mxu1 %vm2897_vm0, %v2896_v1 }
 0x469   :  { %2571 = vmatpush3.bf16.msra.mxu1 %v3288_v31 }
 0x46a   :  { %2572 = vmatprep.subr.bf16.mxu1 %v2895_v0 }
 0x46b   :  { %2544 = vmatpush1.bf16.msra.mxu0 %v3209_v56 }
 0x46c   :  { %2546 = vmatprep.subr.bf16.mxu0 %v3213_v60 }
 0x46d   :  { %2574 = vmatpush3.bf16.msra.mxu1 %v3292_v16 }
 0x46e   :  { %2575 = vmatprep.subr.bf16.mxu1 %v2895_v0 }
 0x46f   :  { %2548 = vmatpush1.bf16.msra.mxu0 %v3215_v3 }
 0x470   :  { %2550 = vmatprep.subr.bf16.mxu0 %v3219_v11 }
 0x471   :  { %2577 = vmatpush3.bf16.msra.mxu1 %v3296_v35 }
 0x472   :  { %2578 = vmatprep.subr.bf16.mxu1 %v2895_v0 }
 0x473   :  { %2552 = vmatpush1.bf16.msra.mxu0 %v3221_v18 }
 0x474   :  { %2554 = vmatprep.subr.bf16.mxu0 %v3225_v20 }
 0x475   :  { %2580 = vmatpush3.bf16.msra.mxu1 %v3300_v59 }
 0x476   :  { %2581 = vmatprep.subr.bf16.mxu1 %v2895_v0 }
 0x477   :  { %2556 = vmatpush1.bf16.msra.mxu0 %v3227_v25 }
 0x478   :  { %2558 = vmatprep.subr.bf16.mxu0 %v3231_v30 }
 0x479   :  { %2583 = vmatpush3.bf16.msra.mxu1 %v3304_v12 }
 0x47a   :  { %2584 = vmatprep.subr.bf16.mxu1 %v2895_v0 }
 0x47b   :  { %2560 = vmatpush1.bf16.msra.mxu0 %v3233_v10 }
 0x47c   :  { %2562 = vmatprep.subr.bf16.mxu0 %v3238_v32 }
 0x47d   :  { %2586 = vmatpush3.bf16.msra.mxu1 %v3235_v15 }
 0x47e   :  { %2587 = vmatprep.subr.bf16.mxu1 %v2895_v0 }
 0x47f   :  { %2564 = vmatpush1.bf16.msra.mxu0 %v3242_v50 }
 0x480   :  { %2566 = vmatprep.subr.bf16.mxu0 %v3248_v6 }
 0x481   :  { %2589 = vmatpush3.bf16.msra.mxu1 %v3244_v53 }
 0x482   :  { %2590 = vmatprep.subr.bf16.mxu1 %v2895_v0 }
 0x483   :  { %2568 = vmatpush1.bf16.msra.mxu0 %v3252_v38 }
 0x484   :  { %2594 = vmatprep.subr.bf16.mxu0 %v3201_v48 }
 0x485   :  { %2592 = vmatpush3.bf16.msra.mxu1 %v3254_v39 }
 0x486   :  { %2625 = vmatprep.subr.bf16.mxu1 %v2895_v0 }
 0x539   :  { %v1055_v36 = vpop.f32.mrb[8].mxu0  ;;  %v1126_v40 = vpop.f32.mrb[8].mxu1 }
 0x53a   :  { %v1130_v42 = vadd.f32 %v1055_v36, %v938_v17  ;;  %v1057_v29 = vpop.f32.mrb[9].mxu0  ;;  %v2151_v47 = vpop.f32.mrb[9].mxu1  ;;  %v1144_v58 = vadd.f32 %v3096_v37, %v1126_v40 }
 0x53b   :  { %v1137_v34 = vadd.f32 %v1057_v29, %v939_v45 }
 0x53c   :  { %v1833_v49 = vmul.f32 -1.442695, %v1130_v42  ;;  %v1157_v42 = vld [vmem:[#allocation3 + $0x88] sm:$0xff] }
 0x53d   :  { %v1834_v43 = vmul.f32 -1.442695, %v1137_v34 }
 0x53e   :  { %2756 = vpow2.f32 %v1833_v49 }
 0x53f   :  { %2758 = vpow2.f32 %v1834_v43 }
 0x548   :  { %v2757_v52 = vpop.eup %2756 }
 0x549   :  { %v1134_v55 = vadd.f32 1.0, %v2757_v52  ;;  %v2759_v61 = vpop.eup %2758 }
 0x54a   :  { %v1141_v57 = vadd.f32 1.0, %v2759_v61  ;;  %v1589_v61 = vld [vmem:[#allocation3 + $0xa8] sm:$0xff] }
 0x54b   :  { %2760 = vrcp.f32 %v1134_v55 }
 0x54c   :  { %2762 = vrcp.f32 %v1141_v57 }
 0x555   :  { %v2761_v63 = vpop.eup %2760 }
 0x556   :  { %v1145_v7 = vmul.f32 %v2761_v63, %v1144_v58  ;;  %v2763_v13 = vpop.eup %2762 }
 0x557   :  { %v1148_v14 = vsub.f32 1.0, %v2763_v13  ;;  %v1150_v22 = vmul.f32 %v2763_v13, %v3264_v27 }
 0x558   :  { %v1146_v8 = vadd.f32 %v1145_v7, %v940_v2  ;;  %v1590_v2 = vld [vmem:[#allocation3 + $0xb0] sm:$0xff] }
 0x55a   :  { %2764 = vtanh.f32 %v1146_v8 }
 0x564   :  { %v2765_v19 = vpop.eup %2764 }
 0x565   :  { %v1149_v5 = vmul.f32 %v2765_v19, %v1148_v14 }
 0x567   :  { %v3316_v24 = vadd.f32 %v1150_v22, %v1149_v5 }
 0x569   :  { %1153 = vst [vmem:[#allocation9 + $0x20] sm:$0xff] %v3316_v24  ;;  %1271 = vmatmul.mubr.f32.vlgmr.msra.gmra.mrb[10].mxu0 %v3316_v24  ;;  %2185 = vmatmul.mubr.f32.vlgmr.msra.gmra.mrb[10].mxu1 %v3316_v24 }
 0x56a   :  { %2596 = vmatpush1.bf16.msra.mxu0 %v3203_v51  ;;  %2627 = vmatpush3.bf16.msra.mxu1 %v3288_v31 }
 0x56b   :  { %2598 = vmatprep.subr.bf16.mxu0 %v3207_v54  ;;  %2628 = vmatprep.subr.bf16.mxu1 %v2895_v0 }
 0x56c   :  { %1487 = vmatprep.mubr.f32.mxu0 %v2896_v1  ;;  %2219 = vmatprep.mubr.msk.f32.mxu1 %vm2897_vm0, %v2896_v1 }
 0x56e   :  { %2600 = vmatpush1.bf16.msra.mxu0 %v3209_v56  ;;  %2630 = vmatpush3.bf16.msra.mxu1 %v3292_v16 }
 0x56f   :  { %2602 = vmatprep.subr.bf16.mxu0 %v3213_v60  ;;  %2631 = vmatprep.subr.bf16.mxu1 %v2895_v0 }
 0x572   :  { %2604 = vmatpush1.bf16.msra.mxu0 %v3215_v3  ;;  %2633 = vmatpush3.bf16.msra.mxu1 %v3296_v35 }
 0x573   :  { %2606 = vmatprep.subr.bf16.mxu0 %v3219_v11  ;;  %2634 = vmatprep.subr.bf16.mxu1 %v2895_v0 }
 0x576   :  { %2608 = vmatpush1.bf16.msra.mxu0 %v3221_v18  ;;  %2636 = vmatpush3.bf16.msra.mxu1 %v3300_v59 }
 0x577   :  { %2610 = vmatprep.subr.bf16.mxu0 %v3225_v20  ;;  %2637 = vmatprep.subr.bf16.mxu1 %v2895_v0 }
 0x57a   :  { %2612 = vmatpush1.bf16.msra.mxu0 %v3227_v25  ;;  %2639 = vmatpush3.bf16.msra.mxu1 %v3304_v12 }
 0x57b   :  { %2614 = vmatprep.subr.bf16.mxu0 %v3231_v30  ;;  %2640 = vmatprep.subr.bf16.mxu1 %v2895_v0 }
 0x57e   :  { %2616 = vmatpush1.bf16.msra.mxu0 %v3233_v10  ;;  %2642 = vmatpush3.bf16.msra.mxu1 %v3235_v15 }
 0x57f   :  { %2618 = vmatprep.subr.bf16.mxu0 %v3238_v32  ;;  %2643 = vmatprep.subr.bf16.mxu1 %v2895_v0 }
 0x582   :  { %2620 = vmatpush1.bf16.msra.mxu0 %v3242_v50  ;;  %2645 = vmatpush3.bf16.msra.mxu1 %v3244_v53 }
 0x583   :  { %2622 = vmatprep.subr.bf16.mxu0 %v3248_v6  ;;  %2646 = vmatprep.subr.bf16.mxu1 %v2895_v0 }
 0x586   :  { %2624 = vmatpush1.bf16.msra.mxu0 %v3252_v38  ;;  %2648 = vmatpush3.bf16.msra.mxu1 %v3254_v39 }
 0x587   :  { %2650 = vmatprep.subr.bf16.mxu0 %v3201_v48  ;;  %2681 = vmatprep.subr.bf16.mxu1 %v2895_v0 }
 0x63c   :  { %v1272_v27 = vpop.f32.mrb[10].mxu0  ;;  %v1343_v46 = vpop.f32.mrb[10].mxu1 }
 0x63d   :  { %v1347_v28 = vadd.f32 %v1272_v27, %v1155_v26  ;;  %v1274_v9 = vpop.f32.mrb[11].mxu0  ;;  %v2186_v21 = vpop.f32.mrb[11].mxu1  ;;  %v1361_v48 = vadd.f32 %v3096_v37, %v1343_v46 }
 0x63e   :  { %v1354_v41 = vadd.f32 %v1274_v9, %v1156_v33 }
 0x63f   :  { %v1835_v23 = vmul.f32 -1.442695, %v1347_v28  ;;  %v1591_v28 = vld [vmem:[#allocation3 + $0xb8] sm:$0xff] }
 0x640   :  { %v1836_v44 = vmul.f32 -1.442695, %v1354_v41 }
 0x641   :  { %2766 = vpow2.f32 %v1835_v23 }
 0x642   :  { %2768 = vpow2.f32 %v1836_v44 }
 0x64b   :  { %v2767_v62 = vpop.eup %2766 }
 0x64c   :  { %v1351_v4 = vadd.f32 1.0, %v2767_v62  ;;  %v2769_v17 = vpop.eup %2768 }
 0x64d   :  { %v1358_v36 = vadd.f32 1.0, %v2769_v17 }
 0x64e   :  { %2770 = vrcp.f32 %v1351_v4 }
 0x64f   :  { %2772 = vrcp.f32 %v1358_v36 }
 0x658   :  { %v2771_v40 = vpop.eup %2770 }
 0x659   :  { %v1362_v45 = vmul.f32 %v2771_v40, %v1361_v48  ;;  %v2773_v47 = vpop.eup %2772 }
 0x65a   :  { %v1365_v49 = vsub.f32 1.0, %v2773_v47  ;;  %v1367_v52 = vmul.f32 %v2773_v47, %v3316_v24 }
 0x65b   :  { %v1363_v29 = vadd.f32 %v1362_v45, %v1157_v42 }
 0x65d   :  { %2774 = vtanh.f32 %v1363_v29 }
 0x667   :  { %v2775_v34 = vpop.eup %2774 }
 0x668   :  { %v1366_v43 = vmul.f32 %v2775_v34, %v1365_v49 }
 0x66a   :  { %v3358_v55 = vadd.f32 %v1367_v52, %v1366_v43 }
 0x66c   :  { %1370 = vst [vmem:[#allocation9 + $0x28] sm:$0xff] %v3358_v55  ;;  %1488 = vmatmul.mubr.f32.vlgmr.msra.gmra.mrb[12].mxu0 %v3358_v55  ;;  %2220 = vmatmul.mubr.f32.vlgmr.msra.gmra.mrb[12].mxu1 %v3358_v55 }
 0x66d   :  { %2652 = vmatpush1.bf16.msra.mxu0 %v3203_v51  ;;  %2683 = vmatpush3.bf16.msra.mxu1 %v3288_v31 }
 0x66e   :  { %2654 = vmatprep.subr.bf16.mxu0 %v3207_v54  ;;  %2684 = vmatprep.subr.bf16.mxu1 %v2895_v0 }
 0x66f   :  { %1704 = vmatprep.mubr.f32.mxu0 %v2896_v1  ;;  %2254 = vmatprep.mubr.msk.f32.mxu1 %vm2897_vm0, %v2896_v1  ;;  %v1372_v1 = vld [vmem:[#allocation3 + $0x90] sm:$0xff] }
 0x671   :  { %2656 = vmatpush1.bf16.msra.mxu0 %v3209_v56  ;;  %2686 = vmatpush3.bf16.msra.mxu1 %v3292_v16 }
 0x672   :  { %2658 = vmatprep.subr.bf16.mxu0 %v3213_v60  ;;  %2687 = vmatprep.subr.bf16.mxu1 %v2895_v0  ;;  %v1373_v60 = vld [vmem:[#allocation3 + $0x98] sm:$0xff] }
 0x675   :  { %2660 = vmatpush1.bf16.msra.mxu0 %v3215_v3  ;;  %2689 = vmatpush3.bf16.msra.mxu1 %v3296_v35 }
 0x676   :  { %2662 = vmatprep.subr.bf16.mxu0 %v3219_v11  ;;  %2690 = vmatprep.subr.bf16.mxu1 %v2895_v0 }
 0x679   :  { %2664 = vmatpush1.bf16.msra.mxu0 %v3221_v18  ;;  %2692 = vmatpush3.bf16.msra.mxu1 %v3300_v59 }
 0x67a   :  { %2666 = vmatprep.subr.bf16.mxu0 %v3225_v20  ;;  %2693 = vmatprep.subr.bf16.mxu1 %v2895_v0 }
 0x67d   :  { %2668 = vmatpush1.bf16.msra.mxu0 %v3227_v25  ;;  %2695 = vmatpush3.bf16.msra.mxu1 %v3304_v12 }
 0x67e   :  { %2670 = vmatprep.subr.bf16.mxu0 %v3231_v30  ;;  %2696 = vmatprep.subr.bf16.mxu1 %v2895_v0 }
 0x681   :  { %2672 = vmatpush1.bf16.msra.mxu0 %v3233_v10  ;;  %2698 = vmatpush3.bf16.msra.mxu1 %v3235_v15 }
 0x682   :  { %2674 = vmatprep.subr.bf16.mxu0 %v3238_v32  ;;  %2699 = vmatprep.subr.bf16.mxu1 %v2895_v0 }
 0x685   :  { %2676 = vmatpush1.bf16.msra.mxu0 %v3242_v50  ;;  %2701 = vmatpush3.bf16.msra.mxu1 %v3244_v53  ;;  %v1374_v53 = vld [vmem:[#allocation3 + $0xa0] sm:$0xff] }
 0x686   :  { %2678 = vmatprep.subr.bf16.mxu0 %v3248_v6  ;;  %2702 = vmatprep.subr.bf16.mxu1 %v2895_v0 }
 0x689   :  { %2680 = vmatpush1.bf16.msra.mxu0 %v3252_v38  ;;  %2704 = vmatpush3.bf16.msra.mxu1 %v3254_v39 }
 0x73f   :  { %v1489_v51 = vpop.f32.mrb[12].mxu0  ;;  %v1560_v54 = vpop.f32.mrb[12].mxu1 }
 0x740   :  { %v1564_v56 = vadd.f32 %v1489_v51, %v1372_v1  ;;  %v1491_v3 = vpop.f32.mrb[13].mxu0  ;;  %v2221_v11 = vpop.f32.mrb[13].mxu1  ;;  %v1578_v32 = vadd.f32 %v3096_v37, %v1560_v54 }
 0x741   :  { %v1571_v20 = vadd.f32 %v1491_v3, %v1373_v60 }
 0x742   :  { %v1837_v18 = vmul.f32 -1.442695, %v1564_v56 }
 0x743   :  { %v1838_v25 = vmul.f32 -1.442695, %v1571_v20 }
 0x744   :  { %2776 = vpow2.f32 %v1837_v18 }
 0x745   :  { %2778 = vpow2.f32 %v1838_v25 }
 0x74e   :  { %v2777_v30 = vpop.eup %2776 }
 0x74f   :  { %v1568_v10 = vadd.f32 1.0, %v2777_v30  ;;  %v2779_v0 = vpop.eup %2778 }
 0x750   :  { %v1575_v15 = vadd.f32 1.0, %v2779_v0 }
 0x751   :  { %2780 = vrcp.f32 %v1568_v10 }
 0x752   :  { %2782 = vrcp.f32 %v1575_v15 }
 0x75b   :  { %v2781_v50 = vpop.eup %2780 }
 0x75c   :  { %v1579_v6 = vmul.f32 %v2781_v50, %v1578_v32  ;;  %v2783_v39 = vpop.eup %2782 }
 0x75d   :  { %v1582_v31 = vsub.f32 1.0, %v2783_v39  ;;  %v1584_v59 = vmul.f32 %v2783_v39, %v3358_v55 }
 0x75e   :  { %v1580_v38 = vadd.f32 %v1579_v6, %v1374_v53 }
 0x760   :  { %2784 = vtanh.f32 %v1580_v38 }
 0x76a   :  { %v2785_v16 = vpop.eup %2784 }
 0x76b   :  { %v1583_v35 = vmul.f32 %v2785_v16, %v1582_v31 }
 0x76d   :  { %v1585_v12 = vadd.f32 %v1584_v59, %v1583_v35 }
 0x76f   :  { %1587 = vst [vmem:[#allocation9 + $0x30] sm:$0xff] %v1585_v12  ;;  %1705 = vmatmul.mubr.f32.vlgmr.msra.gmra.mrb[14].mxu0 %v1585_v12  ;;  %2255 = vmatmul.mubr.f32.vlgmr.msra.gmra.mrb[14].mxu1 %v1585_v12 }
 0x842   :  { %v1706_v57 = vpop.f32.mrb[14].mxu0  ;;  %v1777_v58 = vpop.f32.mrb[14].mxu1 }
 0x843   :  { %v1781_v63 = vadd.f32 %v1706_v57, %v1589_v61  ;;  %v1708_v7 = vpop.f32.mrb[15].mxu0  ;;  %v2256_v8 = vpop.f32.mrb[15].mxu1  ;;  %v1795_v27 = vadd.f32 %v3096_v37, %v1777_v58 }
 0x844   :  { %v1788_v14 = vadd.f32 %v1708_v7, %v1590_v2 }
 0x845   :  { %v1839_v13 = vmul.f32 -1.442695, %v1781_v63 }
 0x846   :  { %v1840_v19 = vmul.f32 -1.442695, %v1788_v14 }
 0x847   :  { %2786 = vpow2.f32 %v1839_v13 }
 0x848   :  { %2788 = vpow2.f32 %v1840_v19 }
 0x851   :  { %v2787_v5 = vpop.eup %2786 }
 0x852   :  { %v1785_v22 = vadd.f32 1.0, %v2787_v5  ;;  %v2789_v24 = vpop.eup %2788 }
 0x853   :  { %v1792_v26 = vadd.f32 1.0, %v2789_v24 }
 0x854   :  { %2790 = vrcp.f32 %v1785_v22 }
 0x855   :  { %2792 = vrcp.f32 %v1792_v26 }
 0x85e   :  { %v2791_v46 = vpop.eup %2790 }
 0x85f   :  { %v1796_v33 = vmul.f32 %v2791_v46, %v1795_v27  ;;  %v2793_v21 = vpop.eup %2792 }
 0x860   :  { %v1799_v23 = vsub.f32 1.0, %v2793_v21  ;;  %v1801_v62 = vmul.f32 %v2793_v21, %v1585_v12 }
 0x861   :  { %v1797_v9 = vadd.f32 %v1796_v33, %v1591_v28 }
 0x863   :  { %2794 = vtanh.f32 %v1797_v9 }
 0x86d   :  { %v2795_v41 = vpop.eup %2794 }
 0x86e   :  { %v1800_v44 = vmul.f32 %v2795_v41, %v1799_v23 }
 0x870   :  { %v1802_v4 = vadd.f32 %v1801_v62, %v1800_v44 }
 0x872   :  { %1804 = vst [vmem:[#allocation9 + $0x38] sm:$0xff] %v1802_v4 }
 0x873   :  { %2873 = shalt.err (!%p2870_p0)
}
 0x874   :  { %s2874_s30 = scalar_lea.hbm %s3415_s4, 1024 }
 0x875   :  { %p2875_p1 = scmp.ne.s32.totalorder %s3415_s4, %s2874_s30  ;;  %p2878_p2 = scmp.lt.u32.totalorder %s2874_s30, %s3415_s4 }
 0x877   :  { %p2880_p3 = pnand %p2878_p2, %p2875_p1 }
 0x879   :  { %2883 = shalt.err (!%p2880_p3)
}
 0x87a   :  { %s2899_s9 = smov 128   ;;  %s2900_s10 = smov 8  }
 0x87b   :  { %1817 = dma.vmem_to_hbm [thread:$0]  %s1812_s26, 1024, %s3415_s4, [#allocation5], %s2899_s9, %s2899_s9, %s2900_s10  }
 0x87c   :  { %2888 = dma.done.wait [#allocation5], 1024  }
 0x87d   :  { %2889 = vsyncadd [#allocation5], 4294966272 }
 0x87e   :  { %1821 = vsyncpa [#allocation4], 1 }
 0x87f   :  { %1822 = vsyncpa [#allocation7], 1 }
 0x880   :  { %1823 = vsyncpa [#allocation5], 1 }

</bundles_post_ra>
